<compile_context>
chip_gen: v7x
topology: tpu7x:2x2x1
jax: 0.10.0
libtpu: 0.0.40
codegen_flags: <defaults>
</compile_context>

<pallas_src>
import functools

import jax
import jax.numpy as jnp
from jax.experimental import pallas as pl
from jax.experimental.pallas import tpu as pltpu

IN_FEATURES = 28 * 28          # 784
HIDDEN = 512
OUT_FEATURES = 10

LANE = 128
OUT_PAD = LANE                 # 10 rounded up to 128 (lane-dense output store)


def mlp_kernel(x_ref, w1_ref, b1_ref, w2_ref, b2_ref, w3_ref, b3_ref, o_ref):
    # In-kernel bf16 cast of the f32 activation tile (avoids a separate wrapper
    # pass over x; VPU cast is hidden under MXU work).
    x = x_ref[...].astype(jnp.bfloat16)
    # Layer 1: Linear(784 -> 512) + ReLU   (bf16 in, f32 accumulate, f32 epilogue)
    h1 = jnp.dot(x, w1_ref[...], preferred_element_type=jnp.float32)
    h1 = jnp.maximum(h1 + b1_ref[...], 0.0).astype(jnp.bfloat16)
    # Layer 2: Linear(512 -> 512) + ReLU
    h2 = jnp.dot(h1, w2_ref[...], preferred_element_type=jnp.float32)
    h2 = jnp.maximum(h2 + b2_ref[...], 0.0).astype(jnp.bfloat16)
    # Layer 3: Linear(512 -> 10 padded to 128), no activation (logits)
    logits = jnp.dot(h2, w3_ref[...], preferred_element_type=jnp.float32)
    o_ref[...] = (logits + b3_ref[...]).astype(o_ref.dtype)


def pack_params(params):
    """Convert f32 (in, out) params into the kernel layout:
    bf16 weights (no K padding needed), layer-3 width zero-padded to 128 lanes."""
    w1, b1, w2, b2, w3, b3 = params

    w3p = jnp.zeros((HIDDEN, OUT_PAD), jnp.bfloat16).at[:, :OUT_FEATURES].set(
        w3.astype(jnp.bfloat16))
    b3p = jnp.zeros((1, OUT_PAD), jnp.float32).at[:, :OUT_FEATURES].set(
        b3.astype(jnp.float32))

    return (w1.astype(jnp.bfloat16), b1.astype(jnp.float32),
            w2.astype(jnp.bfloat16), b2.astype(jnp.float32),
            w3p, b3p)


def _choose_tb(B):
    """Batch-tile size.

    Big tiles amortize the ~0.35 us per-grid-step overhead (v6e roofline), but
    once B exceeds one tile we keep >= 2 grid steps so the "parallel" batch axis
    engages both v7x TensorCores (harmless on single-TC v5e/v6e)."""
    if B >= 1024:
        return 512
    if B >= 512:
        return 256
    if B >= 256:
        return 128
    # Small / online batches: single tile, >= 8 rows for sublane tiling.
    return max(8, min(128, pl.next_power_of_2(int(B))))


@functools.partial(jax.jit, static_argnames=("tb",))
def _forward_impl(x_flat, packed, tb):
    w1, b1, w2, b2, w3, b3 = packed
    B = x_flat.shape[0]
    n_tiles = pl.cdiv(B, tb)
    Bp = n_tiles * tb

    # Tail-only batch pad (no-op when B % tb == 0); padded rows are inert and
    # sliced off below. No K padding: 784 == full array dim is a legal block.
    if Bp != B:
        x_flat = jnp.pad(x_flat, ((0, Bp - B), (0, 0)))

    const = lambda shape: pl.BlockSpec(shape, lambda i: (0,) * len(shape))

    out = pl.pallas_call(
        mlp_kernel,
        out_shape=jax.ShapeDtypeStruct((Bp, OUT_PAD), jnp.float32),
        grid=(n_tiles,),
        in_specs=[
            pl.BlockSpec((tb, IN_FEATURES), lambda i: (i, 0)),  # streaming x tile
            const((IN_FEATURES, HIDDEN)),                        # weights pinned in VMEM
            const((1, HIDDEN)),
            const((HIDDEN, HIDDEN)),
            const((1, HIDDEN)),
            const((HIDDEN, OUT_PAD)),
            const((1, OUT_PAD)),
        ],
        out_specs=pl.BlockSpec((tb, OUT_PAD), lambda i: (i, 0)),
        compiler_params=pltpu.CompilerParams(
            dimension_semantics=("parallel",),
            vmem_limit_bytes=32 << 20,
        ),
    )(x_flat, w1, b1, w2, b2, w3, b3)

    return out[:B, :OUT_FEATURES]


def neural_network_forward(x, packed_params):
    """x: (B, 28, 28) float32. Returns logits (B, 10) float32."""
    B = x.shape[0]
    x_flat = x.reshape(B, IN_FEATURES)          # nn.Flatten()
    return _forward_impl(x_flat, packed_params, _choose_tb(B))


def init_params(key):
    """Deterministic init mimicking nn.Linear's uniform(-1/sqrt(fan_in), 1/sqrt(fan_in)).

    Weights stored as (in_features, out_features) == transpose of PyTorch layout."""
    ks = jax.random.split(key, 6)

    def linear(kw, kb, fan_in, fan_out):
        bound = 1.0 / jnp.sqrt(float(fan_in))
        w = jax.random.uniform(kw, (fan_in, fan_out), jnp.float32, -bound, bound)
        b = jax.random.uniform(kb, (1, fan_out), jnp.float32, -bound, bound)
        return w, b

    w1, b1 = linear(ks[0], ks[1], IN_FEATURES, HIDDEN)
    w2, b2 = linear(ks[2], ks[3], HIDDEN, HIDDEN)
    w3, b3 = linear(ks[4], ks[5], HIDDEN, OUT_FEATURES)
    return (w1, b1, w2, b2, w3, b3)


def reference_forward(x, params):
    """Pure-JAX reference with the same numerics (bf16 matmul inputs, f32 accum)."""
    w1, b1, w2, b2, w3, b3 = params
    xb = x.reshape(x.shape[0], IN_FEATURES).astype(jnp.bfloat16)
    h1 = jnp.dot(xb, w1.astype(jnp.bfloat16),
                 preferred_element_type=jnp.float32) + b1
    h1 = jnp.maximum(h1, 0.0).astype(jnp.bfloat16)
    h2 = jnp.dot(h1, w2.astype(jnp.bfloat16),
                 preferred_element_type=jnp.float32) + b2
    h2 = jnp.maximum(h2, 0.0).astype(jnp.bfloat16)
    return jnp.dot(h2, w3.astype(jnp.bfloat16),
                   preferred_element_type=jnp.float32) + b3


if __name__ == "__main__":
    key = jax.random.PRNGKey(0)
    k_x, k_p = jax.random.split(key)

    B = 2  # small batch of 28x28 "images", matching torch.rand(B, 28, 28)
    x = jax.random.uniform(k_x, (B, 28, 28), jnp.float32)
    params = init_params(k_p)
    packed = pack_params(params)

    logits = neural_network_forward(x, packed)
    logits = jax.block_until_ready(logits)

    ref = reference_forward(x, params)
    assert logits.shape == (B, OUT_FEATURES)
    assert jnp.allclose(logits, ref, atol=1e-2, rtol=1e-2), "mismatch vs reference"

    print("KERNEL_OK")
</pallas_src>

<mosaic_0001>
module attributes {stable_mosaic.version = 11 : i64} {
  func.func @mlp_kernel(%arg0: i32, %arg1: memref<8x784xf32, #tpu.memory_space<vmem>>, %arg2: memref<784x512xbf16, #tpu.memory_space<vmem>>, %arg3: memref<1x512xf32, #tpu.memory_space<vmem>>, %arg4: memref<512x512xbf16, #tpu.memory_space<vmem>>, %arg5: memref<1x512xf32, #tpu.memory_space<vmem>>, %arg6: memref<512x128xbf16, #tpu.memory_space<vmem>>, %arg7: memref<1x128xf32, #tpu.memory_space<vmem>>, %arg8: memref<8x128xf32, #tpu.memory_space<vmem>>) attributes {dimension_semantics = [#tpu.dimension_semantics<parallel>], iteration_bounds = array<i64: 1>, scalar_prefetch = 0 : i64, scratch_operands = 0 : i64, tpu.core_type = #tpu.core_type<tc>, window_params = [{transform_indices = @transform_0, window_bounds = array<i64: 8, 784>}, {pipeline_mode = #tpu.pipeline_mode<synchronous>, transform_indices = @transform_1, window_bounds = array<i64: 784, 512>}, {pipeline_mode = #tpu.pipeline_mode<synchronous>, transform_indices = @transform_2, window_bounds = array<i64: 1, 512>}, {pipeline_mode = #tpu.pipeline_mode<synchronous>, transform_indices = @transform_3, window_bounds = array<i64: 512, 512>}, {pipeline_mode = #tpu.pipeline_mode<synchronous>, transform_indices = @transform_4, window_bounds = array<i64: 1, 512>}, {pipeline_mode = #tpu.pipeline_mode<synchronous>, transform_indices = @transform_5, window_bounds = array<i64: 512, 128>}, {pipeline_mode = #tpu.pipeline_mode<synchronous>, transform_indices = @transform_6, window_bounds = array<i64: 1, 128>}, {transform_indices = @transform_7, window_bounds = array<i64: 8, 128>}]} {
    %c0 = arith.constant 0 : index
    %c0_0 = arith.constant 0 : index
    %0 = vector.load %arg1[%c0, %c0_0] : memref<8x784xf32, #tpu.memory_space<vmem>>, vector<8x784xf32>
    %1 = arith.truncf %0 : vector<8x784xf32> to vector<8x784xbf16>
    %c0_1 = arith.constant 0 : index
    %c0_2 = arith.constant 0 : index
    %2 = vector.load %arg2[%c0_1, %c0_2] : memref<784x512xbf16, #tpu.memory_space<vmem>>, vector<784x512xbf16>
    %cst = arith.constant dense<0.000000e+00> : vector<8x512xf32>
    %3 = tpu.matmul %1, %2, %cst {dimension_numbers = #tpu.dot_dimension_numbers<[1], [0], [0], [1], [0, 0, 1, 1], [], []>} : vector<8x784xbf16>, vector<784x512xbf16>, vector<8x512xf32> -> vector<8x512xf32>
    %c0_3 = arith.constant 0 : index
    %c0_4 = arith.constant 0 : index
    %4 = vector.load %arg3[%c0_3, %c0_4] : memref<1x512xf32, #tpu.memory_space<vmem>>, vector<1x512xf32>
    %5 = vector.broadcast %4 : vector<1x512xf32> to vector<8x512xf32>
    %6 = arith.addf %3, %5 : vector<8x512xf32>
    %cst_5 = arith.constant 0.000000e+00 : f32
    %7 = vector.broadcast %cst_5 : f32 to vector<8x512xf32>
    %8 = arith.maximumf %6, %7 : vector<8x512xf32>
    %9 = arith.truncf %8 : vector<8x512xf32> to vector<8x512xbf16>
    %c0_6 = arith.constant 0 : index
    %c0_7 = arith.constant 0 : index
    %10 = vector.load %arg4[%c0_6, %c0_7] : memref<512x512xbf16, #tpu.memory_space<vmem>>, vector<512x512xbf16>
    %cst_8 = arith.constant dense<0.000000e+00> : vector<8x512xf32>
    %11 = tpu.matmul %9, %10, %cst_8 {dimension_numbers = #tpu.dot_dimension_numbers<[1], [0], [0], [1], [0, 0, 1, 1], [], []>} : vector<8x512xbf16>, vector<512x512xbf16>, vector<8x512xf32> -> vector<8x512xf32>
    %c0_9 = arith.constant 0 : index
    %c0_10 = arith.constant 0 : index
    %12 = vector.load %arg5[%c0_9, %c0_10] : memref<1x512xf32, #tpu.memory_space<vmem>>, vector<1x512xf32>
    %13 = vector.broadcast %12 : vector<1x512xf32> to vector<8x512xf32>
    %14 = arith.addf %11, %13 : vector<8x512xf32>
    %cst_11 = arith.constant 0.000000e+00 : f32
    %15 = vector.broadcast %cst_11 : f32 to vector<8x512xf32>
    %16 = arith.maximumf %14, %15 : vector<8x512xf32>
    %17 = arith.truncf %16 : vector<8x512xf32> to vector<8x512xbf16>
    %c0_12 = arith.constant 0 : index
    %c0_13 = arith.constant 0 : index
    %18 = vector.load %arg6[%c0_12, %c0_13] : memref<512x128xbf16, #tpu.memory_space<vmem>>, vector<512x128xbf16>
    %cst_14 = arith.constant dense<0.000000e+00> : vector<8x128xf32>
    %19 = tpu.matmul %17, %18, %cst_14 {dimension_numbers = #tpu.dot_dimension_numbers<[1], [0], [0], [1], [0, 0, 1, 1], [], []>} : vector<8x512xbf16>, vector<512x128xbf16>, vector<8x128xf32> -> vector<8x128xf32>
    %c0_15 = arith.constant 0 : index
    %c0_16 = arith.constant 0 : index
    %20 = vector.load %arg7[%c0_15, %c0_16] : memref<1x128xf32, #tpu.memory_space<vmem>>, vector<1x128xf32>
    %21 = vector.broadcast %20 : vector<1x128xf32> to vector<8x128xf32>
    %22 = arith.addf %19, %21 : vector<8x128xf32>
    %c0_17 = arith.constant 0 : index
    %c0_18 = arith.constant 0 : index
    %23 = vector.load %arg8[%c0_17, %c0_18] : memref<8x128xf32, #tpu.memory_space<vmem>>, vector<8x128xf32>
    tpu.vector_store %arg8[%c0_17, %c0_18], %22 {strides = array<i32>} : memref<8x128xf32, #tpu.memory_space<vmem>>, vector<8x128xf32>,
    return
  }
  func.func @transform_0(%arg0: i32) -> (i32, i32) {
    %c0_i32 = arith.constant 0 : i32
    %c0_i32_0 = arith.constant 0 : i32
    return %arg0, %c0_i32 : i32, i32
  }
  func.func @transform_1(%arg0: i32) -> (i32, i32) {
    %c0_i32 = arith.constant 0 : i32
    %c0_i32_0 = arith.constant 0 : i32
    %c0_i32_1 = arith.constant 0 : i32
    return %c0_i32, %c0_i32_0 : i32, i32
  }
  func.func @transform_2(%arg0: i32) -> (i32, i32) {
    %c0_i32 = arith.constant 0 : i32
    %c0_i32_0 = arith.constant 0 : i32
    %c0_i32_1 = arith.constant 0 : i32
    return %c0_i32, %c0_i32_0 : i32, i32
  }
  func.func @transform_3(%arg0: i32) -> (i32, i32) {
    %c0_i32 = arith.constant 0 : i32
    %c0_i32_0 = arith.constant 0 : i32
    %c0_i32_1 = arith.constant 0 : i32
    return %c0_i32, %c0_i32_0 : i32, i32
  }
  func.func @transform_4(%arg0: i32) -> (i32, i32) {
    %c0_i32 = arith.constant 0 : i32
    %c0_i32_0 = arith.constant 0 : i32
    %c0_i32_1 = arith.constant 0 : i32
    return %c0_i32, %c0_i32_0 : i32, i32
  }
  func.func @transform_5(%arg0: i32) -> (i32, i32) {
    %c0_i32 = arith.constant 0 : i32
    %c0_i32_0 = arith.constant 0 : i32
    %c0_i32_1 = arith.constant 0 : i32
    return %c0_i32, %c0_i32_0 : i32, i32
  }
  func.func @transform_6(%arg0: i32) -> (i32, i32) {
    %c0_i32 = arith.constant 0 : i32
    %c0_i32_0 = arith.constant 0 : i32
    %c0_i32_1 = arith.constant 0 : i32
    return %c0_i32, %c0_i32_0 : i32, i32
  }
  func.func @transform_7(%arg0: i32) -> (i32, i32) {
    %c0_i32 = arith.constant 0 : i32
    %c0_i32_0 = arith.constant 0 : i32
    return %arg0, %c0_i32 : i32, i32
  }
}

</mosaic_0001>

<bundles_post_ra>
// kernel: _forward_impl.1
= control target key start
LH: loop header
LB: loop body
LE: loop exit
PB: predicated region body
PF: predicated region fallthrough
CT: control target
= control target key end

     0   :  { %12 = vsyncpa [#allocation3], 0  ;;  %s4126_s0 = inlined_call_operand.vmem [shape: f32[8,784], index: 0, kind: input, shape index: {}]   ;;  %s4127_s1 = inlined_call_operand.hbm [shape: bf16[784,512], index: 1, kind: input, shape index: {}]   ;;  %s4128_s2 = inlined_call_operand.vmem [shape: f32[1,512], index: 2, kind: input, shape index: {}]   ;;  %s4129_s3 = inlined_call_operand.hbm [shape: bf16[512,512], index: 3, kind: input, shape index: {}]   ;;  %s4130_s4 = inlined_call_operand.vmem [shape: f32[1,512], index: 4, kind: input, shape index: {}]   ;;  %s4131_s5 = inlined_call_operand.hbm [shape: bf16[512,128], index: 5, kind: input, shape index: {}]   ;;  %s4132_s6 = inlined_call_operand.vmem [shape: f32[1,128], index: 6, kind: input, shape index: {}]   ;;  %s4133_s7 = inlined_call_operand.vmem [shape: f32[8,128], index: 7, kind: output, shape index: {}]  }
   0x1   :  { %13 = vsyncpa [#allocation5], 0  ;;  %s3971_s24 = smov [#allocation4]   ;;  %s3972_s26 = smov [#allocation2]  }
   0x2   :  { %s35_s25 = sshll.u32 %s3971_s24, 4  ;;  %s21_s27 = sshll.u32 %s3972_s26, 4  ;;  %s36_s25 = int_to_ptr.vmem [resolvable:$true] %s35_s25  ;;  %s4019_s27 = int_to_ptr.vmem [resolvable:$true] %s21_s27 }
   0x3   :  { %s3901_s30 = scalar_lea.hbm %s4129_s3, 16384 }
   0x4   :  { %p3902_p0 = scmp.ne.s32.totalorder %s4129_s3, %s3901_s30  ;;  %p3905_p1 = scmp.lt.u32.totalorder %s3901_s30, %s4129_s3 }
   0x6   :  { %p3907_p2 = pnand %p3905_p1, %p3902_p0 }
   0x8   :  { %3910 = shalt.err (!%p3907_p2)
}
   0x9   :  { %s3911_s12 = scalar_lea.vmem %s36_s25, 16384  ;;  %p3916_p4 = scmp.lt.s32.totalorder %s36_s25, %s36_s25 }
   0xa   :  { %p3912_p3 = scmp.ne.s32.totalorder %s36_s25, %s3911_s12  ;;  %p3917_p5 = scmp.lt.s32.totalorder %s3911_s12, %s3911_s12 }
   0xc   :  { %p3918_p6 = por %p3917_p5, %p3916_p4 }
   0xe   :  { %p3919_p7 = pnand %p3918_p6, %p3912_p3 }
  0x10   :  { %3922 = shalt.err (!%p3919_p7)
}
  0x11   :  { %s3973_s13 = smov 256   ;;  %s3974_s14 = smov 16  }
  0x12   :  { %41 = dma.hbm_to_vmem [thread:$0]  %s4129_s3, 16384, %s36_s25, [#allocation5], %s3973_s13, %s3973_s13, %s3974_s14  }
  0x13   :  { %s3923_s19 = scalar_lea.hbm %s4127_s1, 25088 }
  0x14   :  { %p3924_p8 = scmp.ne.s32.totalorder %s4127_s1, %s3923_s19  ;;  %p3927_p9 = scmp.lt.u32.totalorder %s3923_s19, %s4127_s1 }
  0x16   :  { %p3929_p10 = pnand %p3927_p9, %p3924_p8 }
  0x18   :  { %3932 = shalt.err (!%p3929_p10)
}
  0x19   :  { %s3933_s24 = scalar_lea.vmem %s4019_s27, 25088  ;;  %p3938_p12 = scmp.lt.s32.totalorder %s4019_s27, %s4019_s27 }
  0x1a   :  { %p3934_p11 = scmp.ne.s32.totalorder %s4019_s27, %s3933_s24  ;;  %p3939_p13 = scmp.lt.s32.totalorder %s3933_s24, %s3933_s24 }
  0x1c   :  { %p3940_p0 = por %p3939_p13, %p3938_p12 }
  0x1e   :  { %p3941_p1 = pnand %p3940_p0, %p3934_p11 }
  0x20   :  { %3944 = shalt.err (!%p3941_p1)
}
  0x21   :  { %27 = dma.hbm_to_vmem [thread:$0]  %s4127_s1, 25088, %s4019_s27, [#allocation3], %s3973_s13, %s3973_s13, %s3974_s14  }
  0x22   :  { %s3975_s26 = smov [#allocation6]   ;;  %s3945_s8 = scalar_lea.hbm %s4131_s5, 4096 }
  0x23   :  { %s49_s28 = sshll.u32 %s3975_s26, 4  ;;  %p3946_p2 = scmp.ne.s32.totalorder %s4131_s5, %s3945_s8  ;;  %s50_s28 = int_to_ptr.vmem [resolvable:$true] %s49_s28 }
  0x24   :  { %p3949_p3 = scmp.lt.u32.totalorder %s3945_s8, %s4131_s5 }
  0x26   :  { %p3951_p4 = pnand %p3949_p3, %p3946_p2 }
  0x28   :  { %3954 = shalt.err (!%p3951_p4)
}
  0x29   :  { %s3955_s15 = scalar_lea.vmem %s50_s28, 4096  ;;  %p3960_p6 = scmp.lt.s32.totalorder %s50_s28, %s50_s28 }
  0x2a   :  { %p3956_p5 = scmp.ne.s32.totalorder %s50_s28, %s3955_s15  ;;  %p3961_p7 = scmp.lt.s32.totalorder %s3955_s15, %s3955_s15 }
  0x2c   :  { %p3962_p8 = por %p3961_p7, %p3960_p6 }
  0x2e   :  { %p3963_p9 = pnand %p3962_p8, %p3956_p5 }
  0x30   :  { %3966 = shalt.err (!%p3963_p9)
}
  0x31   :  { %s3976_s1 = smov 64   ;;  %s3977_s27 = smov 4  }
  0x32   :  { %55 = dma.hbm_to_vmem [thread:$0]  %s4131_s5, 4096, %s50_s28, [#allocation5], %s3976_s1, %s3976_s1, %s3977_s27  }
  0x33   :  { %3967 = dma.done.wait [#allocation3], 25088  }
  0x34   :  { %3968 = vsyncadd [#allocation3], 4294942208 }
  0x35   :  { %3969 = dma.done.wait [#allocation5], 20480  }
  0x36   :  { %3970 = vsyncadd [#allocation5], 4294946816  ;;  %v3383_v0 = vld [vmem:[#allocation2 + $0x4] ss:$16 sps:$4 sm:$0xff]   ;;  %v3385_v1 = vld [vmem:[#allocation2 + $0xc] ss:$16 sps:$4 sm:$0xff]  }
  0x37   :  { %1284 = vmatprep.subr.bf16.mxu0 %v3383_v0  ;;  %v3387_v2 = vld [vmem:[#allocation2] ss:$16 sps:$4 sm:$0xff]   ;;  %v3388_v3 = vld [vmem:[#allocation2 + $0x8] ss:$16 sps:$4 sm:$0xff]   ;;  %1448 = vmatprep.subr.bf16.mxu1 %v3385_v1  ;;  %v3389_v4 = vld [vmem:[#allocation2 + $0x24] ss:$16 sps:$4 sm:$0xff]  }
  0x38   :  { %1285 = vmatpush1.bf16.msra.mxu0 %v3387_v2  ;;  %1449 = vmatpush1.bf16.msra.mxu1 %v3388_v3  ;;  %v3391_v5 = vld [vmem:[#allocation2 + $0x2c] ss:$16 sps:$4 sm:$0xff]   ;;  %v3393_v6 = vld [vmem:[#allocation2 + $0x20] ss:$16 sps:$4 sm:$0xff]   ;;  %v3394_v7 = vld [vmem:[#allocation2 + $0x28] ss:$16 sps:$4 sm:$0xff]  }
  0x39   :  { %1286 = vmatprep.subr.bf16.mxu0 %v3389_v4  ;;  %1450 = vmatprep.subr.bf16.mxu1 %v3391_v5  ;;  %v3395_v8 = vld [vmem:[#allocation2 + $0x44] ss:$16 sps:$4 sm:$0xff]   ;;  %v3397_v9 = vld [vmem:[#allocation2 + $0x4c] ss:$16 sps:$4 sm:$0xff]   ;;  %v3399_v10 = vld [vmem:[#allocation2 + $0x40] ss:$16 sps:$4 sm:$0xff]  }
  0x3a   :  { %v3400_v11 = vld [vmem:[#allocation2 + $0x48] ss:$16 sps:$4 sm:$0xff]   ;;  %v3401_v12 = vld [vmem:[#allocation2 + $0x64] ss:$16 sps:$4 sm:$0xff]   ;;  %v3403_v13 = vld [vmem:[#allocation2 + $0x6c] ss:$16 sps:$4 sm:$0xff]  }
  0x3b   :  { %v3405_v14 = vld [vmem:[#allocation2 + $0x60] ss:$16 sps:$4 sm:$0xff]   ;;  %v3406_v15 = vld [vmem:[#allocation2 + $0x68] ss:$16 sps:$4 sm:$0xff]   ;;  %v3407_v16 = vld [vmem:[#allocation2 + $0x84] ss:$16 sps:$4 sm:$0xff]  }
  0x3c   :  { %1287 = vmatpush1.bf16.msra.mxu0 %v3393_v6  ;;  %1451 = vmatpush1.bf16.msra.mxu1 %v3394_v7  ;;  %v3409_v17 = vld [vmem:[#allocation2 + $0x8c] ss:$16 sps:$4 sm:$0xff]   ;;  %v3411_v18 = vld [vmem:[#allocation2 + $0x80] ss:$16 sps:$4 sm:$0xff]   ;;  %v3412_v19 = vld [vmem:[#allocation2 + $0x88] ss:$16 sps:$4 sm:$0xff]  }
  0x3d   :  { %1288 = vmatprep.subr.bf16.mxu0 %v3395_v8  ;;  %1452 = vmatprep.subr.bf16.mxu1 %v3397_v9  ;;  %v3413_v20 = vld [vmem:[#allocation2 + $0xa4] ss:$16 sps:$4 sm:$0xff]   ;;  %v3415_v21 = vld [vmem:[#allocation2 + $0xac] ss:$16 sps:$4 sm:$0xff]   ;;  %v3417_v22 = vld [vmem:[#allocation2 + $0xa0] ss:$16 sps:$4 sm:$0xff]  }
  0x3e   :  { %v3418_v23 = vld [vmem:[#allocation2 + $0xa8] ss:$16 sps:$4 sm:$0xff]   ;;  %v3419_v24 = vld [vmem:[#allocation2 + $0xc4] ss:$16 sps:$4 sm:$0xff]   ;;  %v3421_v25 = vld [vmem:[#allocation2 + $0xcc] ss:$16 sps:$4 sm:$0xff]  }
  0x3f   :  { %v3423_v26 = vld [vmem:[#allocation2 + $0xc0] ss:$16 sps:$4 sm:$0xff]   ;;  %v3424_v27 = vld [vmem:[#allocation2 + $0xc8] ss:$16 sps:$4 sm:$0xff]   ;;  %v3425_v28 = vld [vmem:[#allocation2 + $0xe4] ss:$16 sps:$4 sm:$0xff]  }
  0x40   :  { %1289 = vmatpush1.bf16.msra.mxu0 %v3399_v10  ;;  %1453 = vmatpush1.bf16.msra.mxu1 %v3400_v11  ;;  %v3427_v29 = vld [vmem:[#allocation2 + $0xec] ss:$16 sps:$4 sm:$0xff]   ;;  %v3429_v30 = vld [vmem:[#allocation2 + $0xe0] ss:$16 sps:$4 sm:$0xff]   ;;  %v3430_v31 = vld [vmem:[#allocation2 + $0xe8] ss:$16 sps:$4 sm:$0xff]  }
  0x41   :  { %1290 = vmatprep.subr.bf16.mxu0 %v3401_v12  ;;  %1454 = vmatprep.subr.bf16.mxu1 %v3403_v13  ;;  %v3431_v32 = vld [vmem:[#allocation2 + $0x104] ss:$16 sps:$4 sm:$0xff]   ;;  %v3433_v33 = vld [vmem:[#allocation2 + $0x10c] ss:$16 sps:$4 sm:$0xff]   ;;  %v3435_v34 = vld [vmem:[#allocation2 + $0x100] ss:$16 sps:$4 sm:$0xff]  }
  0x42   :  { %v3436_v35 = vld [vmem:[#allocation2 + $0x108] ss:$16 sps:$4 sm:$0xff]   ;;  %v3437_v36 = vld [vmem:[#allocation2 + $0x124] ss:$16 sps:$4 sm:$0xff]   ;;  %v3439_v37 = vld [vmem:[#allocation2 + $0x12c] ss:$16 sps:$4 sm:$0xff]  }
  0x43   :  { %v3441_v38 = vld [vmem:[#allocation2 + $0x120] ss:$16 sps:$4 sm:$0xff]   ;;  %v3442_v39 = vld [vmem:[#allocation2 + $0x128] ss:$16 sps:$4 sm:$0xff]   ;;  %v3443_v40 = vld [vmem:[#allocation2 + $0x144] ss:$16 sps:$4 sm:$0xff]  }
  0x44   :  { %1291 = vmatpush1.bf16.msra.mxu0 %v3405_v14  ;;  %1455 = vmatpush1.bf16.msra.mxu1 %v3406_v15  ;;  %v3445_v41 = vld [vmem:[#allocation2 + $0x14c] ss:$16 sps:$4 sm:$0xff]   ;;  %v3447_v42 = vld [vmem:[#allocation2 + $0x140] ss:$16 sps:$4 sm:$0xff]   ;;  %v3448_v43 = vld [vmem:[#allocation2 + $0x148] ss:$16 sps:$4 sm:$0xff]  }
  0x45   :  { %1292 = vmatprep.subr.bf16.mxu0 %v3407_v16  ;;  %1456 = vmatprep.subr.bf16.mxu1 %v3409_v17  ;;  %v3449_v44 = vld [vmem:[#allocation2 + $0x164] ss:$16 sps:$4 sm:$0xff]   ;;  %v3451_v45 = vld [vmem:[#allocation2 + $0x16c] ss:$16 sps:$4 sm:$0xff]   ;;  %v3453_v47 = vld [vmem:[#allocation2 + $0x160] ss:$16 sps:$4 sm:$0xff]  }
  0x46   :  { %v69_v46 = vld [vmem:[%s4126_s0 + $0x8] sm:$0xff]  ;;  %v3455_v50 = vld [vmem:[#allocation2 + $0x184] ss:$16 sps:$4 sm:$0xff]   ;;  %v3459_v52 = vld [vmem:[#allocation2 + $0x180] ss:$16 sps:$4 sm:$0xff]   ;;  %vm1280_vm0 = vcmask 130048  }
  0x47   :  { %v76_v48 = vpack.c.bf16 %v69_v46, %v69_v46  ;;  %v3454_v49 = vld [vmem:[#allocation2 + $0x168] ss:$16 sps:$4 sm:$0xff]   ;;  %v3457_v51 = vld [vmem:[#allocation2 + $0x18c] ss:$16 sps:$4 sm:$0xff]   ;;  %v3461_v54 = vld [vmem:[#allocation2 + $0x1a4] ss:$16 sps:$4 sm:$0xff]  }
  0x48   :  { %1293 = vmatpush1.bf16.msra.mxu0 %v3411_v18  ;;  %1457 = vmatpush1.bf16.msra.mxu1 %v3412_v19  ;;  %v3460_v53 = vld [vmem:[#allocation2 + $0x188] ss:$16 sps:$4 sm:$0xff]   ;;  %v3463_v55 = vld [vmem:[#allocation2 + $0x1ac] ss:$16 sps:$4 sm:$0xff]   ;;  %v3465_v56 = vld [vmem:[#allocation2 + $0x1a0] ss:$16 sps:$4 sm:$0xff]  }
  0x49   :  { %1294 = vmatprep.subr.bf16.mxu0 %v3413_v20  ;;  %1458 = vmatprep.subr.bf16.mxu1 %v3415_v21  ;;  %v3466_v57 = vld [vmem:[#allocation2 + $0x1a8] ss:$16 sps:$4 sm:$0xff]   ;;  %v3467_v58 = vld [vmem:[#allocation2 + $0x1c4] ss:$16 sps:$4 sm:$0xff]   ;;  %v3469_v59 = vld [vmem:[#allocation2 + $0x1cc] ss:$16 sps:$4 sm:$0xff]  }
  0x4a   :  { %1316 = vmatprep.mubr.bf16.mxu0 %v76_v48  ;;  %1480 = vmatprep.mubr.bf16.mxu1 %v76_v48  ;;  %v3471_v60 = vld [vmem:[#allocation2 + $0x1c0] ss:$16 sps:$4 sm:$0xff]   ;;  %v3472_v61 = vld [vmem:[#allocation2 + $0x1c8] ss:$16 sps:$4 sm:$0xff]   ;;  %v3473_v62 = vld [vmem:[#allocation2 + $0x1e4] ss:$16 sps:$4 sm:$0xff]  }
  0x4b   :  { %v3475_v63 = vld [vmem:[#allocation2 + $0x1ec] ss:$16 sps:$4 sm:$0xff]   ;;  %v3477_v0 = vld [vmem:[#allocation2 + $0x1e0] ss:$16 sps:$4 sm:$0xff]   ;;  %v3478_v1 = vld [vmem:[#allocation2 + $0x1e8] ss:$16 sps:$4 sm:$0xff]  }
  0x4c   :  { %1295 = vmatpush1.bf16.msra.mxu0 %v3417_v22  ;;  %1459 = vmatpush1.bf16.msra.mxu1 %v3418_v23  ;;  %v68_v2 = vld [vmem:[%s4126_s0] sm:$0xff]  ;;  %v3484_v4 = vld [vmem:[#allocation2 + $0x20c] ss:$16 sps:$4 sm:$0xff]   ;;  %v3482_v7 = vld [vmem:[#allocation2 + $0x208] ss:$16 sps:$4 sm:$0xff]  }
  0x4d   :  { %1296 = vmatprep.subr.bf16.mxu0 %v3419_v24  ;;  %1460 = vmatprep.subr.bf16.mxu1 %v3421_v25  ;;  %v3481_v3 = vld [vmem:[#allocation2 + $0x204] ss:$16 sps:$4 sm:$0xff]   ;;  %v75_v5 = vpack.c.bf16 %v68_v2, %v68_v2  ;;  %v3479_v6 = vld [vmem:[#allocation2 + $0x200] ss:$16 sps:$4 sm:$0xff]   ;;  %v3490_v9 = vld [vmem:[#allocation2 + $0x22c] ss:$16 sps:$4 sm:$0xff]  }
  0x4e   :  { %v3487_v8 = vld [vmem:[#allocation2 + $0x224] ss:$16 sps:$4 sm:$0xff]   ;;  %v3485_v10 = vld [vmem:[#allocation2 + $0x220] ss:$16 sps:$4 sm:$0xff]   ;;  %v3488_v11 = vld [vmem:[#allocation2 + $0x228] ss:$16 sps:$4 sm:$0xff]  }
  0x4f   :  { %v3493_v12 = vld [vmem:[#allocation2 + $0x244] ss:$16 sps:$4 sm:$0xff]   ;;  %v3496_v13 = vld [vmem:[#allocation2 + $0x24c] ss:$16 sps:$4 sm:$0xff]   ;;  %v3491_v14 = vld [vmem:[#allocation2 + $0x240] ss:$16 sps:$4 sm:$0xff]  }
  0x50   :  { %1297 = vmatpush1.bf16.msra.mxu0 %v3423_v26  ;;  %1461 = vmatpush1.bf16.msra.mxu1 %v3424_v27  ;;  %v3494_v15 = vld [vmem:[#allocation2 + $0x248] ss:$16 sps:$4 sm:$0xff]   ;;  %v3499_v16 = vld [vmem:[#allocation2 + $0x264] ss:$16 sps:$4 sm:$0xff]   ;;  %v3502_v17 = vld [vmem:[#allocation2 + $0x26c] ss:$16 sps:$4 sm:$0xff]  }
  0x51   :  { %1298 = vmatprep.subr.bf16.mxu0 %v3425_v28  ;;  %1462 = vmatprep.subr.bf16.mxu1 %v3427_v29  ;;  %v3497_v18 = vld [vmem:[#allocation2 + $0x260] ss:$16 sps:$4 sm:$0xff]   ;;  %v3500_v19 = vld [vmem:[#allocation2 + $0x268] ss:$16 sps:$4 sm:$0xff]   ;;  %v3505_v20 = vld [vmem:[#allocation2 + $0x284] ss:$16 sps:$4 sm:$0xff]  }
  0x52   :  { %v3508_v21 = vld [vmem:[#allocation2 + $0x28c] ss:$16 sps:$4 sm:$0xff]   ;;  %v3503_v22 = vld [vmem:[#allocation2 + $0x280] ss:$16 sps:$4 sm:$0xff]   ;;  %v3506_v23 = vld [vmem:[#allocation2 + $0x288] ss:$16 sps:$4 sm:$0xff]  }
  0x53   :  { %v3511_v24 = vld [vmem:[#allocation2 + $0x2a4] ss:$16 sps:$4 sm:$0xff]   ;;  %v3514_v25 = vld [vmem:[#allocation2 + $0x2ac] ss:$16 sps:$4 sm:$0xff]   ;;  %v3509_v26 = vld [vmem:[#allocation2 + $0x2a0] ss:$16 sps:$4 sm:$0xff]  }
  0x54   :  { %1299 = vmatpush1.bf16.msra.mxu0 %v3429_v30  ;;  %1463 = vmatpush1.bf16.msra.mxu1 %v3430_v31  ;;  %v3512_v27 = vld [vmem:[#allocation2 + $0x2a8] ss:$16 sps:$4 sm:$0xff]   ;;  %v3517_v28 = vld [vmem:[#allocation2 + $0x2c4] ss:$16 sps:$4 sm:$0xff]   ;;  %v3520_v29 = vld [vmem:[#allocation2 + $0x2cc] ss:$16 sps:$4 sm:$0xff]  }
  0x55   :  { %1300 = vmatprep.subr.bf16.mxu0 %v3431_v32  ;;  %1464 = vmatprep.subr.bf16.mxu1 %v3433_v33  ;;  %v71_v30 = vld [vmem:[%s4126_s0 + $0x18] sm:$0xff]  ;;  %v3515_v31 = vld [vmem:[#allocation2 + $0x2c0] ss:$16 sps:$4 sm:$0xff]   ;;  %v3541_v46 = vld [vmem:[#allocation2 + $0x344] ss:$16 sps:$4 sm:$0xff]  }
  0x56   :  { %v78_v32 = vpack.c.bf16 %v71_v30, %v71_v30  ;;  %v3518_v33 = vld [vmem:[#allocation2 + $0x2c8] ss:$16 sps:$4 sm:$0xff]   ;;  %v3539_v48 = vld [vmem:[#allocation2 + $0x340] ss:$16 sps:$4 sm:$0xff]   ;;  %v3571_v2 = vld [vmem:[#allocation2 + $0x3e4] ss:$16 sps:$4 sm:$0xff]  }
  0x57   :  { %v3607_v30 = vld [vmem:[#allocation2 + $0x4a4] ss:$16 sps:$4 sm:$0xff]  }
  0x58   :  { %1301 = vmatpush1.bf16.msra.mxu0 %v3435_v34  ;;  %1465 = vmatpush1.bf16.msra.mxu1 %v3436_v35  ;;  %v3523_v34 = vld [vmem:[#allocation2 + $0x2e4] ss:$16 sps:$4 sm:$0xff]   ;;  %v3526_v35 = vld [vmem:[#allocation2 + $0x2ec] ss:$16 sps:$4 sm:$0xff]  }
  0x59   :  { %1302 = vmatprep.subr.bf16.mxu0 %v3437_v36  ;;  %1466 = vmatprep.subr.bf16.mxu1 %v3439_v37  ;;  %v3521_v36 = vld [vmem:[#allocation2 + $0x2e0] ss:$16 sps:$4 sm:$0xff]   ;;  %v3524_v37 = vld [vmem:[#allocation2 + $0x2e8] ss:$16 sps:$4 sm:$0xff]  }
  0x5c   :  { %1303 = vmatpush1.bf16.msra.mxu0 %v3441_v38  ;;  %1467 = vmatpush1.bf16.msra.mxu1 %v3442_v39  ;;  %v3529_v38 = vld [vmem:[#allocation2 + $0x304] ss:$16 sps:$4 sm:$0xff]   ;;  %v3532_v39 = vld [vmem:[#allocation2 + $0x30c] ss:$16 sps:$4 sm:$0xff]  }
  0x5d   :  { %1304 = vmatprep.subr.bf16.mxu0 %v3443_v40  ;;  %1468 = vmatprep.subr.bf16.mxu1 %v3445_v41  ;;  %v3527_v40 = vld [vmem:[#allocation2 + $0x300] ss:$16 sps:$4 sm:$0xff]   ;;  %v3530_v41 = vld [vmem:[#allocation2 + $0x308] ss:$16 sps:$4 sm:$0xff]  }
  0x60   :  { %1305 = vmatpush1.bf16.msra.mxu0 %v3447_v42  ;;  %1469 = vmatpush1.bf16.msra.mxu1 %v3448_v43  ;;  %v3535_v42 = vld [vmem:[#allocation2 + $0x324] ss:$16 sps:$4 sm:$0xff]   ;;  %v3538_v43 = vld [vmem:[#allocation2 + $0x32c] ss:$16 sps:$4 sm:$0xff]  }
  0x61   :  { %1306 = vmatprep.subr.bf16.mxu0 %v3449_v44  ;;  %1470 = vmatprep.subr.bf16.mxu1 %v3451_v45  ;;  %v3533_v44 = vld [vmem:[#allocation2 + $0x320] ss:$16 sps:$4 sm:$0xff]   ;;  %v3536_v45 = vld [vmem:[#allocation2 + $0x328] ss:$16 sps:$4 sm:$0xff]  }
  0x64   :  { %1307 = vmatpush1.bf16.msra.mxu0 %v3453_v47  ;;  %1471 = vmatpush1.bf16.msra.mxu1 %v3454_v49  ;;  %v3544_v47 = vld [vmem:[#allocation2 + $0x34c] ss:$16 sps:$4 sm:$0xff]   ;;  %v3542_v49 = vld [vmem:[#allocation2 + $0x348] ss:$16 sps:$4 sm:$0xff]  }
  0x65   :  { %1308 = vmatprep.subr.bf16.mxu0 %v3455_v50  ;;  %1472 = vmatprep.subr.bf16.mxu1 %v3457_v51  ;;  %v3547_v50 = vld [vmem:[#allocation2 + $0x364] ss:$16 sps:$4 sm:$0xff]   ;;  %v3550_v51 = vld [vmem:[#allocation2 + $0x36c] ss:$16 sps:$4 sm:$0xff]  }
  0x68   :  { %1309 = vmatpush1.bf16.msra.mxu0 %v3459_v52  ;;  %1473 = vmatpush1.bf16.msra.mxu1 %v3460_v53  ;;  %v3545_v52 = vld [vmem:[#allocation2 + $0x360] ss:$16 sps:$4 sm:$0xff]   ;;  %v3548_v53 = vld [vmem:[#allocation2 + $0x368] ss:$16 sps:$4 sm:$0xff]  }
  0x69   :  { %1310 = vmatprep.subr.bf16.mxu0 %v3461_v54  ;;  %1474 = vmatprep.subr.bf16.mxu1 %v3463_v55  ;;  %v3553_v54 = vld [vmem:[#allocation2 + $0x384] ss:$16 sps:$4 sm:$0xff]   ;;  %v3556_v55 = vld [vmem:[#allocation2 + $0x38c] ss:$16 sps:$4 sm:$0xff]  }
  0x6c   :  { %1311 = vmatpush1.bf16.msra.mxu0 %v3465_v56  ;;  %1475 = vmatpush1.bf16.msra.mxu1 %v3466_v57  ;;  %v3551_v56 = vld [vmem:[#allocation2 + $0x380] ss:$16 sps:$4 sm:$0xff]   ;;  %v3554_v57 = vld [vmem:[#allocation2 + $0x388] ss:$16 sps:$4 sm:$0xff]  }
  0x6d   :  { %1312 = vmatprep.subr.bf16.mxu0 %v3467_v58  ;;  %1476 = vmatprep.subr.bf16.mxu1 %v3469_v59  ;;  %v3559_v58 = vld [vmem:[#allocation2 + $0x3a4] ss:$16 sps:$4 sm:$0xff]   ;;  %v3562_v59 = vld [vmem:[#allocation2 + $0x3ac] ss:$16 sps:$4 sm:$0xff]  }
  0x70   :  { %1313 = vmatpush1.bf16.msra.mxu0 %v3471_v60  ;;  %1477 = vmatpush1.bf16.msra.mxu1 %v3472_v61  ;;  %v3557_v60 = vld [vmem:[#allocation2 + $0x3a0] ss:$16 sps:$4 sm:$0xff]   ;;  %v3560_v61 = vld [vmem:[#allocation2 + $0x3a8] ss:$16 sps:$4 sm:$0xff]  }
  0x71   :  { %1314 = vmatprep.subr.bf16.mxu0 %v3473_v62  ;;  %1478 = vmatprep.subr.bf16.mxu1 %v3475_v63  ;;  %v3565_v62 = vld [vmem:[#allocation2 + $0x3c4] ss:$16 sps:$4 sm:$0xff]   ;;  %v3568_v63 = vld [vmem:[#allocation2 + $0x3cc] ss:$16 sps:$4 sm:$0xff]  }
  0x74   :  { %1315 = vmatpush1.bf16.msra.mxu0 %v3477_v0  ;;  %1479 = vmatpush1.bf16.msra.mxu1 %v3478_v1  ;;  %v3563_v0 = vld [vmem:[#allocation2 + $0x3c0] ss:$16 sps:$4 sm:$0xff]   ;;  %v3566_v1 = vld [vmem:[#allocation2 + $0x3c8] ss:$16 sps:$4 sm:$0xff]  }
  0x75   :  { %1325 = vmatprep.subr.bf16.mxu0 %v3481_v3  ;;  %1489 = vmatprep.subr.bf16.mxu1 %v3484_v4  ;;  %v3574_v3 = vld [vmem:[#allocation2 + $0x3ec] ss:$16 sps:$4 sm:$0xff]   ;;  %v3569_v4 = vld [vmem:[#allocation2 + $0x3e0] ss:$16 sps:$4 sm:$0xff]  }
  0x77   :  { %1317 = vmatmul.mubr.bf16.vlgmr.msra.gmra.mrb[0].mxu0 %v75_v5  ;;  %1481 = vmatmul.mubr.bf16.vlgmr.msra.gmra.mrb[0].mxu1 %v75_v5  ;;  %v3572_v5 = vld [vmem:[#allocation2 + $0x3e8] ss:$16 sps:$4 sm:$0xff]  }
  0x78   :  { %1326 = vmatpush1.bf16.msra.mxu0 %v3479_v6  ;;  %1490 = vmatpush1.bf16.msra.mxu1 %v3482_v7  ;;  %v3577_v6 = vld [vmem:[#allocation2 + $0x404] ss:$16 sps:$4 sm:$0xff]  }
  0x79   :  { %1327 = vmatprep.subr.bf16.mxu0 %v3487_v8  ;;  %1491 = vmatprep.subr.bf16.mxu1 %v3490_v9  ;;  %v70_v7 = vld [vmem:[%s4126_s0 + $0x10] sm:$0xff]  ;;  %v3580_v8 = vld [vmem:[#allocation2 + $0x40c] ss:$16 sps:$4 sm:$0xff]  }
  0x7a   :  { %1357 = vmatprep.mubr.bf16.mxu0 %v78_v32  ;;  %1521 = vmatprep.mubr.bf16.mxu1 %v78_v32  ;;  %v3575_v9 = vld [vmem:[#allocation2 + $0x400] ss:$16 sps:$4 sm:$0xff]  }
  0x7b   :  { %v3605_v32 = vld [vmem:[#allocation2 + $0x4a0] ss:$16 sps:$4 sm:$0xff]  }
  0x7c   :  { %1328 = vmatpush1.bf16.msra.mxu0 %v3485_v10  ;;  %1492 = vmatpush1.bf16.msra.mxu1 %v3488_v11  ;;  %v77_v10 = vpack.c.bf16 %v70_v7, %v70_v7  ;;  %v3578_v11 = vld [vmem:[#allocation2 + $0x408] ss:$16 sps:$4 sm:$0xff]   ;;  %v3670_v7 = vld [vmem:[#allocation2 + $0x5ec] ss:$16 sps:$4 sm:$0xff]  }
  0x7d   :  { %1329 = vmatprep.subr.bf16.mxu0 %v3493_v12  ;;  %1493 = vmatprep.subr.bf16.mxu1 %v3496_v13  ;;  %v3583_v12 = vld [vmem:[#allocation2 + $0x424] ss:$16 sps:$4 sm:$0xff]   ;;  %v3586_v13 = vld [vmem:[#allocation2 + $0x42c] ss:$16 sps:$4 sm:$0xff]  }
  0x80   :  { %1330 = vmatpush1.bf16.msra.mxu0 %v3491_v14  ;;  %1494 = vmatpush1.bf16.msra.mxu1 %v3494_v15  ;;  %v73_v14 = vld [vmem:[%s4126_s0 + $0x28] sm:$0xff] }
  0x81   :  { %1331 = vmatprep.subr.bf16.mxu0 %v3499_v16  ;;  %1495 = vmatprep.subr.bf16.mxu1 %v3502_v17  ;;  %v80_v15 = vpack.c.bf16 %v73_v14, %v73_v14  ;;  %v3581_v16 = vld [vmem:[#allocation2 + $0x420] ss:$16 sps:$4 sm:$0xff]   ;;  %v3584_v17 = vld [vmem:[#allocation2 + $0x428] ss:$16 sps:$4 sm:$0xff]  }
  0x82   :  { %v3674_v14 = vld [vmem:[#allocation2 + $0x608] ss:$16 sps:$4 sm:$0xff]  }
  0x84   :  { %1332 = vmatpush1.bf16.msra.mxu0 %v3497_v18  ;;  %1496 = vmatpush1.bf16.msra.mxu1 %v3500_v19  ;;  %v3589_v18 = vld [vmem:[#allocation2 + $0x444] ss:$16 sps:$4 sm:$0xff]   ;;  %v3592_v19 = vld [vmem:[#allocation2 + $0x44c] ss:$16 sps:$4 sm:$0xff]  }
  0x85   :  { %1333 = vmatprep.subr.bf16.mxu0 %v3505_v20  ;;  %1497 = vmatprep.subr.bf16.mxu1 %v3508_v21  ;;  %v3587_v20 = vld [vmem:[#allocation2 + $0x440] ss:$16 sps:$4 sm:$0xff]   ;;  %v3590_v21 = vld [vmem:[#allocation2 + $0x448] ss:$16 sps:$4 sm:$0xff]  }
  0x88   :  { %1334 = vmatpush1.bf16.msra.mxu0 %v3503_v22  ;;  %1498 = vmatpush1.bf16.msra.mxu1 %v3506_v23  ;;  %v3595_v22 = vld [vmem:[#allocation2 + $0x464] ss:$16 sps:$4 sm:$0xff]   ;;  %v3598_v23 = vld [vmem:[#allocation2 + $0x46c] ss:$16 sps:$4 sm:$0xff]  }
  0x89   :  { %1335 = vmatprep.subr.bf16.mxu0 %v3511_v24  ;;  %1499 = vmatprep.subr.bf16.mxu1 %v3514_v25  ;;  %v3593_v24 = vld [vmem:[#allocation2 + $0x460] ss:$16 sps:$4 sm:$0xff]   ;;  %v3596_v25 = vld [vmem:[#allocation2 + $0x468] ss:$16 sps:$4 sm:$0xff]  }
  0x8c   :  { %1336 = vmatpush1.bf16.msra.mxu0 %v3509_v26  ;;  %1500 = vmatpush1.bf16.msra.mxu1 %v3512_v27  ;;  %v3601_v26 = vld [vmem:[#allocation2 + $0x484] ss:$16 sps:$4 sm:$0xff]   ;;  %v3604_v27 = vld [vmem:[#allocation2 + $0x48c] ss:$16 sps:$4 sm:$0xff]  }
  0x8d   :  { %1337 = vmatprep.subr.bf16.mxu0 %v3517_v28  ;;  %1501 = vmatprep.subr.bf16.mxu1 %v3520_v29  ;;  %v3599_v28 = vld [vmem:[#allocation2 + $0x480] ss:$16 sps:$4 sm:$0xff]   ;;  %v3602_v29 = vld [vmem:[#allocation2 + $0x488] ss:$16 sps:$4 sm:$0xff]  }
  0x90   :  { %1338 = vmatpush1.bf16.msra.mxu0 %v3515_v31  ;;  %1502 = vmatpush1.bf16.msra.mxu1 %v3518_v33  ;;  %v3610_v31 = vld [vmem:[#allocation2 + $0x4ac] ss:$16 sps:$4 sm:$0xff]   ;;  %v3608_v33 = vld [vmem:[#allocation2 + $0x4a8] ss:$16 sps:$4 sm:$0xff]  }
  0x91   :  { %1339 = vmatprep.subr.bf16.mxu0 %v3523_v34  ;;  %1503 = vmatprep.subr.bf16.mxu1 %v3526_v35  ;;  %v3613_v34 = vld [vmem:[#allocation2 + $0x4c4] ss:$16 sps:$4 sm:$0xff]   ;;  %v3616_v35 = vld [vmem:[#allocation2 + $0x4cc] ss:$16 sps:$4 sm:$0xff]  }
  0x94   :  { %1340 = vmatpush1.bf16.msra.mxu0 %v3521_v36  ;;  %1504 = vmatpush1.bf16.msra.mxu1 %v3524_v37  ;;  %v3611_v36 = vld [vmem:[#allocation2 + $0x4c0] ss:$16 sps:$4 sm:$0xff]   ;;  %v3614_v37 = vld [vmem:[#allocation2 + $0x4c8] ss:$16 sps:$4 sm:$0xff]  }
  0x95   :  { %1341 = vmatprep.subr.bf16.mxu0 %v3529_v38  ;;  %1505 = vmatprep.subr.bf16.mxu1 %v3532_v39  ;;  %v3619_v38 = vld [vmem:[#allocation2 + $0x4e4] ss:$16 sps:$4 sm:$0xff]   ;;  %v3622_v39 = vld [vmem:[#allocation2 + $0x4ec] ss:$16 sps:$4 sm:$0xff]  }
  0x98   :  { %1342 = vmatpush1.bf16.msra.mxu0 %v3527_v40  ;;  %1506 = vmatpush1.bf16.msra.mxu1 %v3530_v41  ;;  %v3617_v40 = vld [vmem:[#allocation2 + $0x4e0] ss:$16 sps:$4 sm:$0xff]   ;;  %v3620_v41 = vld [vmem:[#allocation2 + $0x4e8] ss:$16 sps:$4 sm:$0xff]  }
  0x99   :  { %1343 = vmatprep.subr.bf16.mxu0 %v3535_v42  ;;  %1507 = vmatprep.subr.bf16.mxu1 %v3538_v43  ;;  %v3625_v42 = vld [vmem:[#allocation2 + $0x504] ss:$16 sps:$4 sm:$0xff]   ;;  %v3628_v43 = vld [vmem:[#allocation2 + $0x50c] ss:$16 sps:$4 sm:$0xff]  }
  0x9c   :  { %1344 = vmatpush1.bf16.msra.mxu0 %v3533_v44  ;;  %1508 = vmatpush1.bf16.msra.mxu1 %v3536_v45  ;;  %v3623_v44 = vld [vmem:[#allocation2 + $0x500] ss:$16 sps:$4 sm:$0xff]   ;;  %v3626_v45 = vld [vmem:[#allocation2 + $0x508] ss:$16 sps:$4 sm:$0xff]  }
  0x9d   :  { %1345 = vmatprep.subr.bf16.mxu0 %v3541_v46  ;;  %1509 = vmatprep.subr.bf16.mxu1 %v3544_v47  ;;  %v3631_v46 = vld [vmem:[#allocation2 + $0x524] ss:$16 sps:$4 sm:$0xff]   ;;  %v3634_v47 = vld [vmem:[#allocation2 + $0x52c] ss:$16 sps:$4 sm:$0xff]  }
  0xa0   :  { %1346 = vmatpush1.bf16.msra.mxu0 %v3539_v48  ;;  %1510 = vmatpush1.bf16.msra.mxu1 %v3542_v49  ;;  %v3629_v48 = vld [vmem:[#allocation2 + $0x520] ss:$16 sps:$4 sm:$0xff]   ;;  %v3632_v49 = vld [vmem:[#allocation2 + $0x528] ss:$16 sps:$4 sm:$0xff]  }
  0xa1   :  { %1347 = vmatprep.subr.bf16.mxu0 %v3547_v50  ;;  %1511 = vmatprep.subr.bf16.mxu1 %v3550_v51  ;;  %v3637_v50 = vld [vmem:[#allocation2 + $0x544] ss:$16 sps:$4 sm:$0xff]   ;;  %v3640_v51 = vld [vmem:[#allocation2 + $0x54c] ss:$16 sps:$4 sm:$0xff]  }
  0xa4   :  { %1348 = vmatpush1.bf16.msra.mxu0 %v3545_v52  ;;  %1512 = vmatpush1.bf16.msra.mxu1 %v3548_v53  ;;  %v3635_v52 = vld [vmem:[#allocation2 + $0x540] ss:$16 sps:$4 sm:$0xff]   ;;  %v3638_v53 = vld [vmem:[#allocation2 + $0x548] ss:$16 sps:$4 sm:$0xff]  }
  0xa5   :  { %1349 = vmatprep.subr.bf16.mxu0 %v3553_v54  ;;  %1513 = vmatprep.subr.bf16.mxu1 %v3556_v55  ;;  %v3643_v54 = vld [vmem:[#allocation2 + $0x564] ss:$16 sps:$4 sm:$0xff]   ;;  %v3646_v55 = vld [vmem:[#allocation2 + $0x56c] ss:$16 sps:$4 sm:$0xff]  }
  0xa8   :  { %1350 = vmatpush1.bf16.msra.mxu0 %v3551_v56  ;;  %1514 = vmatpush1.bf16.msra.mxu1 %v3554_v57  ;;  %v3641_v56 = vld [vmem:[#allocation2 + $0x560] ss:$16 sps:$4 sm:$0xff]   ;;  %v3644_v57 = vld [vmem:[#allocation2 + $0x568] ss:$16 sps:$4 sm:$0xff]  }
  0xa9   :  { %1351 = vmatprep.subr.bf16.mxu0 %v3559_v58  ;;  %1515 = vmatprep.subr.bf16.mxu1 %v3562_v59  ;;  %v3649_v58 = vld [vmem:[#allocation2 + $0x584] ss:$16 sps:$4 sm:$0xff]   ;;  %v3652_v59 = vld [vmem:[#allocation2 + $0x58c] ss:$16 sps:$4 sm:$0xff]  }
  0xac   :  { %1352 = vmatpush1.bf16.msra.mxu0 %v3557_v60  ;;  %1516 = vmatpush1.bf16.msra.mxu1 %v3560_v61  ;;  %v3647_v60 = vld [vmem:[#allocation2 + $0x580] ss:$16 sps:$4 sm:$0xff]   ;;  %v3650_v61 = vld [vmem:[#allocation2 + $0x588] ss:$16 sps:$4 sm:$0xff]  }
  0xad   :  { %1353 = vmatprep.subr.bf16.mxu0 %v3565_v62  ;;  %1517 = vmatprep.subr.bf16.mxu1 %v3568_v63  ;;  %v3655_v62 = vld [vmem:[#allocation2 + $0x5a4] ss:$16 sps:$4 sm:$0xff]   ;;  %v3658_v63 = vld [vmem:[#allocation2 + $0x5ac] ss:$16 sps:$4 sm:$0xff]  }
  0xb0   :  { %1354 = vmatpush1.bf16.msra.mxu0 %v3563_v0  ;;  %1518 = vmatpush1.bf16.msra.mxu1 %v3566_v1  ;;  %v3653_v0 = vld [vmem:[#allocation2 + $0x5a0] ss:$16 sps:$4 sm:$0xff]   ;;  %v3656_v1 = vld [vmem:[#allocation2 + $0x5a8] ss:$16 sps:$4 sm:$0xff]  }
  0xb1   :  { %1355 = vmatprep.subr.bf16.mxu0 %v3571_v2  ;;  %1519 = vmatprep.subr.bf16.mxu1 %v3574_v3  ;;  %v3661_v2 = vld [vmem:[#allocation2 + $0x5c4] ss:$16 sps:$4 sm:$0xff]   ;;  %v3664_v3 = vld [vmem:[#allocation2 + $0x5cc] ss:$16 sps:$4 sm:$0xff]  }
  0xb4   :  { %1356 = vmatpush1.bf16.msra.mxu0 %v3569_v4  ;;  %1520 = vmatpush1.bf16.msra.mxu1 %v3572_v5  ;;  %v3659_v4 = vld [vmem:[#allocation2 + $0x5c0] ss:$16 sps:$4 sm:$0xff]   ;;  %v3662_v5 = vld [vmem:[#allocation2 + $0x5c8] ss:$16 sps:$4 sm:$0xff]  }
  0xb5   :  { %1366 = vmatprep.subr.bf16.mxu0 %v3577_v6  ;;  %1530 = vmatprep.subr.bf16.mxu1 %v3580_v8  ;;  %v3667_v6 = vld [vmem:[#allocation2 + $0x5e4] ss:$16 sps:$4 sm:$0xff]   ;;  %v3665_v8 = vld [vmem:[#allocation2 + $0x5e0] ss:$16 sps:$4 sm:$0xff]  }
  0xb7   :  { %1358 = vmatmul.mubr.bf16.vlgmr.msra.gmra.mrb[0].mxu0 %v77_v10  ;;  %1522 = vmatmul.mubr.bf16.vlgmr.msra.gmra.mrb[0].mxu1 %v77_v10  ;;  %v72_v10 = vld [vmem:[%s4126_s0 + $0x20] sm:$0xff] }
  0xb8   :  { %1367 = vmatpush1.bf16.msra.mxu0 %v3575_v9  ;;  %1531 = vmatpush1.bf16.msra.mxu1 %v3578_v11  ;;  %v3668_v9 = vld [vmem:[#allocation2 + $0x5e8] ss:$16 sps:$4 sm:$0xff]   ;;  %v3673_v11 = vld [vmem:[#allocation2 + $0x604] ss:$16 sps:$4 sm:$0xff]  }
  0xb9   :  { %1368 = vmatprep.subr.bf16.mxu0 %v3583_v12  ;;  %1532 = vmatprep.subr.bf16.mxu1 %v3586_v13  ;;  %v3676_v12 = vld [vmem:[#allocation2 + $0x60c] ss:$16 sps:$4 sm:$0xff]   ;;  %v3671_v13 = vld [vmem:[#allocation2 + $0x600] ss:$16 sps:$4 sm:$0xff]  }
  0xba   :  { %1398 = vmatprep.mubr.bf16.mxu0 %v80_v15  ;;  %1562 = vmatprep.mubr.bf16.mxu1 %v80_v15  ;;  %v79_v15 = vpack.c.bf16 %v72_v10, %v72_v10  ;;  %v3758_v10 = vld [vmem:[#allocation4 + $0x1a8] ss:$16 sps:$4 sm:$0xff]  }
  0xbc   :  { %1369 = vmatpush1.bf16.msra.mxu0 %v3581_v16  ;;  %1533 = vmatpush1.bf16.msra.mxu1 %v3584_v17  ;;  %v3679_v16 = vld [vmem:[#allocation4 + $0x4] ss:$16 sps:$4 sm:$0xff]   ;;  %v3682_v17 = vld [vmem:[#allocation4 + $0xc] ss:$16 sps:$4 sm:$0xff]  }
  0xbd   :  { %1370 = vmatprep.subr.bf16.mxu0 %v3589_v18  ;;  %1534 = vmatprep.subr.bf16.mxu1 %v3592_v19  ;;  %v3978_v18 = vmov 0   ;;  %v74_v19 = vld [vmem:[%s4126_s0 + $0x30] sm:$0xff] }
  0xc0   :  { %1371 = vmatpush1.bf16.msra.mxu0 %v3587_v20  ;;  %1535 = vmatpush1.bf16.msra.mxu1 %v3590_v21  ;;  %v3677_v20 = vld [vmem:[#allocation4] ss:$16 sps:$4 sm:$0xff]   ;;  %v3680_v21 = vld [vmem:[#allocation4 + $0x8] ss:$16 sps:$4 sm:$0xff]  }
  0xc1   :  { %1372 = vmatprep.subr.bf16.mxu0 %v3595_v22  ;;  %1536 = vmatprep.subr.bf16.mxu1 %v3598_v23  ;;  %v81_v22 = vpack.c.bf16 %v74_v19, %v74_v19  ;;  %v3685_v23 = vld [vmem:[#allocation4 + $0x24] ss:$16 sps:$4 sm:$0xff]  }
  0xc2   :  { %v3775_v19 = vld [vmem:[#allocation4 + $0x204] ss:$16 sps:$4 sm:$0xff]  }
  0xc4   :  { %1373 = vmatpush1.bf16.msra.mxu0 %v3593_v24  ;;  %1537 = vmatpush1.bf16.msra.mxu1 %v3596_v25  ;;  %v3688_v24 = vld [vmem:[#allocation4 + $0x2c] ss:$16 sps:$4 sm:$0xff]   ;;  %v3683_v25 = vld [vmem:[#allocation4 + $0x20] ss:$16 sps:$4 sm:$0xff]  }
  0xc5   :  { %1374 = vmatprep.subr.bf16.mxu0 %v3601_v26  ;;  %1538 = vmatprep.subr.bf16.mxu1 %v3604_v27  ;;  %v3686_v26 = vld [vmem:[#allocation4 + $0x28] ss:$16 sps:$4 sm:$0xff]   ;;  %v3691_v27 = vld [vmem:[#allocation4 + $0x44] ss:$16 sps:$4 sm:$0xff]  }
  0xc8   :  { %1375 = vmatpush1.bf16.msra.mxu0 %v3599_v28  ;;  %1539 = vmatpush1.bf16.msra.mxu1 %v3602_v29  ;;  %v3694_v28 = vld [vmem:[#allocation4 + $0x4c] ss:$16 sps:$4 sm:$0xff]   ;;  %v3689_v29 = vld [vmem:[#allocation4 + $0x40] ss:$16 sps:$4 sm:$0xff]  }
  0xc9   :  { %1376 = vmatprep.subr.bf16.mxu0 %v3607_v30  ;;  %1540 = vmatprep.subr.bf16.mxu1 %v3610_v31  ;;  %v3692_v30 = vld [vmem:[#allocation4 + $0x48] ss:$16 sps:$4 sm:$0xff]   ;;  %v3697_v31 = vld [vmem:[#allocation4 + $0x64] ss:$16 sps:$4 sm:$0xff]  }
  0xcc   :  { %1377 = vmatpush1.bf16.msra.mxu0 %v3605_v32  ;;  %1541 = vmatpush1.bf16.msra.mxu1 %v3608_v33  ;;  %v3700_v32 = vld [vmem:[#allocation4 + $0x6c] ss:$16 sps:$4 sm:$0xff]   ;;  %v3695_v33 = vld [vmem:[#allocation4 + $0x60] ss:$16 sps:$4 sm:$0xff]  }
  0xcd   :  { %1378 = vmatprep.subr.bf16.mxu0 %v3613_v34  ;;  %1542 = vmatprep.subr.bf16.mxu1 %v3616_v35  ;;  %v3698_v34 = vld [vmem:[#allocation4 + $0x68] ss:$16 sps:$4 sm:$0xff]   ;;  %v3703_v35 = vld [vmem:[#allocation4 + $0x84] ss:$16 sps:$4 sm:$0xff]  }
  0xd0   :  { %1379 = vmatpush1.bf16.msra.mxu0 %v3611_v36  ;;  %1543 = vmatpush1.bf16.msra.mxu1 %v3614_v37  ;;  %v3706_v36 = vld [vmem:[#allocation4 + $0x8c] ss:$16 sps:$4 sm:$0xff]   ;;  %v3701_v37 = vld [vmem:[#allocation4 + $0x80] ss:$16 sps:$4 sm:$0xff]  }
  0xd1   :  { %1380 = vmatprep.subr.bf16.mxu0 %v3619_v38  ;;  %1544 = vmatprep.subr.bf16.mxu1 %v3622_v39  ;;  %v3704_v38 = vld [vmem:[#allocation4 + $0x88] ss:$16 sps:$4 sm:$0xff]   ;;  %v3709_v39 = vld [vmem:[#allocation4 + $0xa4] ss:$16 sps:$4 sm:$0xff]  }
  0xd4   :  { %1381 = vmatpush1.bf16.msra.mxu0 %v3617_v40  ;;  %1545 = vmatpush1.bf16.msra.mxu1 %v3620_v41  ;;  %v3712_v40 = vld [vmem:[#allocation4 + $0xac] ss:$16 sps:$4 sm:$0xff]   ;;  %v3707_v41 = vld [vmem:[#allocation4 + $0xa0] ss:$16 sps:$4 sm:$0xff]  }
  0xd5   :  { %1382 = vmatprep.subr.bf16.mxu0 %v3625_v42  ;;  %1546 = vmatprep.subr.bf16.mxu1 %v3628_v43  ;;  %v3710_v42 = vld [vmem:[#allocation4 + $0xa8] ss:$16 sps:$4 sm:$0xff]   ;;  %v3715_v43 = vld [vmem:[#allocation4 + $0xc4] ss:$16 sps:$4 sm:$0xff]  }
  0xd8   :  { %1383 = vmatpush1.bf16.msra.mxu0 %v3623_v44  ;;  %1547 = vmatpush1.bf16.msra.mxu1 %v3626_v45  ;;  %v3718_v44 = vld [vmem:[#allocation4 + $0xcc] ss:$16 sps:$4 sm:$0xff]   ;;  %v3713_v45 = vld [vmem:[#allocation4 + $0xc0] ss:$16 sps:$4 sm:$0xff]  }
  0xd9   :  { %1384 = vmatprep.subr.bf16.mxu0 %v3631_v46  ;;  %1548 = vmatprep.subr.bf16.mxu1 %v3634_v47  ;;  %v3716_v46 = vld [vmem:[#allocation4 + $0xc8] ss:$16 sps:$4 sm:$0xff]   ;;  %v3721_v47 = vld [vmem:[#allocation4 + $0xe4] ss:$16 sps:$4 sm:$0xff]  }
  0xdc   :  { %1385 = vmatpush1.bf16.msra.mxu0 %v3629_v48  ;;  %1549 = vmatpush1.bf16.msra.mxu1 %v3632_v49  ;;  %v3724_v48 = vld [vmem:[#allocation4 + $0xec] ss:$16 sps:$4 sm:$0xff]   ;;  %v3719_v49 = vld [vmem:[#allocation4 + $0xe0] ss:$16 sps:$4 sm:$0xff]  }
  0xdd   :  { %1386 = vmatprep.subr.bf16.mxu0 %v3637_v50  ;;  %1550 = vmatprep.subr.bf16.mxu1 %v3640_v51  ;;  %v3722_v50 = vld [vmem:[#allocation4 + $0xe8] ss:$16 sps:$4 sm:$0xff]   ;;  %v3727_v51 = vld [vmem:[#allocation4 + $0x104] ss:$16 sps:$4 sm:$0xff]  }
  0xe0   :  { %1387 = vmatpush1.bf16.msra.mxu0 %v3635_v52  ;;  %1551 = vmatpush1.bf16.msra.mxu1 %v3638_v53  ;;  %v3730_v52 = vld [vmem:[#allocation4 + $0x10c] ss:$16 sps:$4 sm:$0xff]   ;;  %v3725_v53 = vld [vmem:[#allocation4 + $0x100] ss:$16 sps:$4 sm:$0xff]  }
  0xe1   :  { %1388 = vmatprep.subr.bf16.mxu0 %v3643_v54  ;;  %1552 = vmatprep.subr.bf16.mxu1 %v3646_v55  ;;  %v3728_v54 = vld [vmem:[#allocation4 + $0x108] ss:$16 sps:$4 sm:$0xff]   ;;  %v3733_v55 = vld [vmem:[#allocation4 + $0x124] ss:$16 sps:$4 sm:$0xff]  }
  0xe4   :  { %1389 = vmatpush1.bf16.msra.mxu0 %v3641_v56  ;;  %1553 = vmatpush1.bf16.msra.mxu1 %v3644_v57  ;;  %v3736_v56 = vld [vmem:[#allocation4 + $0x12c] ss:$16 sps:$4 sm:$0xff]   ;;  %v3731_v57 = vld [vmem:[#allocation4 + $0x120] ss:$16 sps:$4 sm:$0xff]  }
  0xe5   :  { %1390 = vmatprep.subr.bf16.mxu0 %v3649_v58  ;;  %1554 = vmatprep.subr.bf16.mxu1 %v3652_v59  ;;  %v3734_v58 = vld [vmem:[#allocation4 + $0x128] ss:$16 sps:$4 sm:$0xff]   ;;  %v3739_v59 = vld [vmem:[#allocation4 + $0x144] ss:$16 sps:$4 sm:$0xff]  }
  0xe8   :  { %1391 = vmatpush1.bf16.msra.mxu0 %v3647_v60  ;;  %1555 = vmatpush1.bf16.msra.mxu1 %v3650_v61  ;;  %v3742_v60 = vld [vmem:[#allocation4 + $0x14c] ss:$16 sps:$4 sm:$0xff]   ;;  %v3737_v61 = vld [vmem:[#allocation4 + $0x140] ss:$16 sps:$4 sm:$0xff]  }
  0xe9   :  { %1392 = vmatprep.subr.bf16.mxu0 %v3655_v62  ;;  %1556 = vmatprep.subr.bf16.mxu1 %v3658_v63  ;;  %v3740_v62 = vld [vmem:[#allocation4 + $0x148] ss:$16 sps:$4 sm:$0xff]   ;;  %v3745_v63 = vld [vmem:[#allocation4 + $0x164] ss:$16 sps:$4 sm:$0xff]  }
  0xec   :  { %1393 = vmatpush1.bf16.msra.mxu0 %v3653_v0  ;;  %1557 = vmatpush1.bf16.msra.mxu1 %v3656_v1  ;;  %v3748_v0 = vld [vmem:[#allocation4 + $0x16c] ss:$16 sps:$4 sm:$0xff]   ;;  %v3743_v1 = vld [vmem:[#allocation4 + $0x160] ss:$16 sps:$4 sm:$0xff]  }
  0xed   :  { %1394 = vmatprep.subr.bf16.mxu0 %v3661_v2  ;;  %1558 = vmatprep.subr.bf16.mxu1 %v3664_v3  ;;  %v3746_v2 = vld [vmem:[#allocation4 + $0x168] ss:$16 sps:$4 sm:$0xff]   ;;  %v3751_v3 = vld [vmem:[#allocation4 + $0x184] ss:$16 sps:$4 sm:$0xff]  }
  0xf0   :  { %1395 = vmatpush1.bf16.msra.mxu0 %v3659_v4  ;;  %1559 = vmatpush1.bf16.msra.mxu1 %v3662_v5  ;;  %v3754_v4 = vld [vmem:[#allocation4 + $0x18c] ss:$16 sps:$4 sm:$0xff]   ;;  %v3749_v5 = vld [vmem:[#allocation4 + $0x180] ss:$16 sps:$4 sm:$0xff]  }
  0xf1   :  { %1396 = vmatprep.subr.bf16.mxu0 %v3667_v6  ;;  %1560 = vmatprep.subr.bf16.mxu1 %v3670_v7  ;;  %v3752_v6 = vld [vmem:[#allocation4 + $0x188] ss:$16 sps:$4 sm:$0xff]   ;;  %v3757_v7 = vld [vmem:[#allocation4 + $0x1a4] ss:$16 sps:$4 sm:$0xff]  }
  0xf4   :  { %1397 = vmatpush1.bf16.msra.mxu0 %v3665_v8  ;;  %1561 = vmatpush1.bf16.msra.mxu1 %v3668_v9  ;;  %v3760_v8 = vld [vmem:[#allocation4 + $0x1ac] ss:$16 sps:$4 sm:$0xff]   ;;  %v3755_v9 = vld [vmem:[#allocation4 + $0x1a0] ss:$16 sps:$4 sm:$0xff]  }
  0xf5   :  { %1407 = vmatprep.subr.bf16.mxu0 %v3673_v11  ;;  %1571 = vmatprep.subr.bf16.mxu1 %v3676_v12  ;;  %v3763_v11 = vld [vmem:[#allocation4 + $0x1c4] ss:$16 sps:$4 sm:$0xff]   ;;  %v3766_v12 = vld [vmem:[#allocation4 + $0x1cc] ss:$16 sps:$4 sm:$0xff]  }
  0xf7   :  { %1399 = vmatmul.mubr.bf16.vlgmr.msra.gmra.mrb[0].mxu0 %v79_v15  ;;  %1563 = vmatmul.mubr.bf16.vlgmr.msra.gmra.mrb[0].mxu1 %v79_v15  ;;  %v3769_v15 = vld [vmem:[#allocation4 + $0x1e4] ss:$16 sps:$4 sm:$0xff]  }
  0xf8   :  { %1408 = vmatpush1.bf16.msra.mxu0 %v3671_v13  ;;  %1572 = vmatpush1.bf16.msra.mxu1 %v3674_v14  ;;  %v3761_v13 = vld [vmem:[#allocation4 + $0x1c0] ss:$16 sps:$4 sm:$0xff]   ;;  %v3764_v14 = vld [vmem:[#allocation4 + $0x1c8] ss:$16 sps:$4 sm:$0xff]  }
  0xf9   :  { %1439 = vmatprep.mubr.bf16.mxu0 %v3978_v18  ;;  %1603 = vmatprep.mubr.bf16.mxu1 %v3978_v18  ;;  %v3770_v18 = vld [vmem:[#allocation4 + $0x1e8] ss:$16 sps:$4 sm:$0xff]  }
  0xfa   :  { %2410 = vmatprep.subr.bf16.mxu0 %v3679_v16  ;;  %2492 = vmatprep.subr.bf16.mxu1 %v3682_v17  ;;  %v3772_v16 = vld [vmem:[#allocation4 + $0x1ec] ss:$16 sps:$4 sm:$0xff]   ;;  %v3767_v17 = vld [vmem:[#allocation4 + $0x1e0] ss:$16 sps:$4 sm:$0xff]  }
 0x103   :  { %3128 = vmatmul.mubr.msk.bf16.vlgmr.msra.gmra.mrb[0].mxu0 %vm1280_vm0, %v81_v22  ;;  %3129 = vmatmul.mubr.msk.bf16.vlgmr.msra.gmra.mrb[0].mxu1 %vm1280_vm0, %v81_v22 }
 0x104   :  { %2411 = vmatpush1.bf16.msra.mxu0 %v3677_v20  ;;  %2493 = vmatpush1.bf16.msra.mxu1 %v3680_v21  ;;  %v3778_v20 = vld [vmem:[#allocation4 + $0x20c] ss:$16 sps:$4 sm:$0xff]   ;;  %v280_v21 = vlaneseq }
 0x105   :  { %2412 = vmatprep.subr.bf16.mxu0 %v3685_v23  ;;  %2494 = vmatprep.subr.bf16.mxu1 %v3688_v24  ;;  %v4089_v24 = vld [vmem:[%s4128_s2] sm:$0xf] }
 0x106   :  { %v4083_v22 = vshrl.u32 %v280_v21, 7  ;;  %v3835_v21 = vld [vmem:[#allocation4 + $0x344] ss:$16 sps:$4 sm:$0xff]  }
 0x108   :  { %2413 = vmatpush1.bf16.msra.mxu0 %v3683_v25  ;;  %2495 = vmatpush1.bf16.msra.mxu1 %v3686_v26  ;;  %v282_v23 = vsub.s32 0, %v4083_v22  ;;  %v286_v25 = vsub.s32 1, %v4083_v22  ;;  %v294_v26 = vsub.s32 3, %v4083_v22 }
 0x109   :  { %2414 = vmatprep.subr.bf16.mxu0 %v3691_v27  ;;  %2496 = vmatprep.subr.bf16.mxu1 %v3694_v28 }
 0x10a   :  { %v283_v27 = vrot.slane %v4089_v24, %v282_v23  ;;  %v287_v28 = vrot.slane %v4089_v24, %v286_v25 }
 0x10c   :  { %2415 = vmatpush1.bf16.msra.mxu0 %v3689_v29  ;;  %2497 = vmatpush1.bf16.msra.mxu1 %v3692_v30  ;;  %v295_v29 = vrot.slane %v4089_v24, %v294_v26 }
 0x10d   :  { %2416 = vmatprep.subr.bf16.mxu0 %v3697_v31  ;;  %2498 = vmatprep.subr.bf16.mxu1 %v3700_v32 }
 0x110   :  { %2417 = vmatpush1.bf16.msra.mxu0 %v3695_v33  ;;  %2499 = vmatpush1.bf16.msra.mxu1 %v3698_v34 }
 0x111   :  { %2418 = vmatprep.subr.bf16.mxu0 %v3703_v35  ;;  %2500 = vmatprep.subr.bf16.mxu1 %v3706_v36 }
 0x114   :  { %2419 = vmatpush1.bf16.msra.mxu0 %v3701_v37  ;;  %2501 = vmatpush1.bf16.msra.mxu1 %v3704_v38 }
 0x115   :  { %2420 = vmatprep.subr.bf16.mxu0 %v3709_v39  ;;  %2502 = vmatprep.subr.bf16.mxu1 %v3712_v40 }
 0x118   :  { %2421 = vmatpush1.bf16.msra.mxu0 %v3707_v41  ;;  %2503 = vmatpush1.bf16.msra.mxu1 %v3710_v42 }
 0x119   :  { %2422 = vmatprep.subr.bf16.mxu0 %v3715_v43  ;;  %2504 = vmatprep.subr.bf16.mxu1 %v3718_v44 }
 0x11c   :  { %2423 = vmatpush1.bf16.msra.mxu0 %v3713_v45  ;;  %2505 = vmatpush1.bf16.msra.mxu1 %v3716_v46  ;;  %v3773_v45 = vld [vmem:[#allocation4 + $0x200] ss:$16 sps:$4 sm:$0xff]   ;;  %v3776_v46 = vld [vmem:[#allocation4 + $0x208] ss:$16 sps:$4 sm:$0xff]  }
 0x11d   :  { %2424 = vmatprep.subr.bf16.mxu0 %v3721_v47  ;;  %2506 = vmatprep.subr.bf16.mxu1 %v3724_v48  ;;  %v3781_v48 = vld [vmem:[#allocation4 + $0x224] ss:$16 sps:$4 sm:$0xff]  }
 0x120   :  { %2425 = vmatpush1.bf16.msra.mxu0 %v3719_v49  ;;  %2507 = vmatpush1.bf16.msra.mxu1 %v3722_v50  ;;  %v3784_v49 = vld [vmem:[#allocation4 + $0x22c] ss:$16 sps:$4 sm:$0xff]  }
 0x121   :  { %2426 = vmatprep.subr.bf16.mxu0 %v3727_v51  ;;  %2508 = vmatprep.subr.bf16.mxu1 %v3730_v52  ;;  %v3779_v51 = vld [vmem:[#allocation4 + $0x220] ss:$16 sps:$4 sm:$0xff]   ;;  %v3782_v52 = vld [vmem:[#allocation4 + $0x228] ss:$16 sps:$4 sm:$0xff]  }
 0x124   :  { %2427 = vmatpush1.bf16.msra.mxu0 %v3725_v53  ;;  %2509 = vmatpush1.bf16.msra.mxu1 %v3728_v54  ;;  %v3787_v53 = vld [vmem:[#allocation4 + $0x244] ss:$16 sps:$4 sm:$0xff]   ;;  %v3790_v54 = vld [vmem:[#allocation4 + $0x24c] ss:$16 sps:$4 sm:$0xff]  }
 0x125   :  { %2428 = vmatprep.subr.bf16.mxu0 %v3733_v55  ;;  %2510 = vmatprep.subr.bf16.mxu1 %v3736_v56  ;;  %v3785_v55 = vld [vmem:[#allocation4 + $0x240] ss:$16 sps:$4 sm:$0xff]   ;;  %v3788_v56 = vld [vmem:[#allocation4 + $0x248] ss:$16 sps:$4 sm:$0xff]  }
 0x128   :  { %2429 = vmatpush1.bf16.msra.mxu0 %v3731_v57  ;;  %2511 = vmatpush1.bf16.msra.mxu1 %v3734_v58  ;;  %v3793_v57 = vld [vmem:[#allocation4 + $0x264] ss:$16 sps:$4 sm:$0xff]   ;;  %v3796_v58 = vld [vmem:[#allocation4 + $0x26c] ss:$16 sps:$4 sm:$0xff]  }
 0x129   :  { %2430 = vmatprep.subr.bf16.mxu0 %v3739_v59  ;;  %2512 = vmatprep.subr.bf16.mxu1 %v3742_v60  ;;  %v3791_v59 = vld [vmem:[#allocation4 + $0x260] ss:$16 sps:$4 sm:$0xff]   ;;  %v3794_v60 = vld [vmem:[#allocation4 + $0x268] ss:$16 sps:$4 sm:$0xff]  }
 0x12c   :  { %2431 = vmatpush1.bf16.msra.mxu0 %v3737_v61  ;;  %2513 = vmatpush1.bf16.msra.mxu1 %v3740_v62  ;;  %v3799_v61 = vld [vmem:[#allocation4 + $0x284] ss:$16 sps:$4 sm:$0xff]   ;;  %v3802_v62 = vld [vmem:[#allocation4 + $0x28c] ss:$16 sps:$4 sm:$0xff]  }
 0x12d   :  { %2432 = vmatprep.subr.bf16.mxu0 %v3745_v63  ;;  %2514 = vmatprep.subr.bf16.mxu1 %v3748_v0  ;;  %v3797_v63 = vld [vmem:[#allocation4 + $0x280] ss:$16 sps:$4 sm:$0xff]   ;;  %v3800_v0 = vld [vmem:[#allocation4 + $0x288] ss:$16 sps:$4 sm:$0xff]  }
 0x130   :  { %2433 = vmatpush1.bf16.msra.mxu0 %v3743_v1  ;;  %2515 = vmatpush1.bf16.msra.mxu1 %v3746_v2  ;;  %v3805_v1 = vld [vmem:[#allocation4 + $0x2a4] ss:$16 sps:$4 sm:$0xff]   ;;  %v3808_v2 = vld [vmem:[#allocation4 + $0x2ac] ss:$16 sps:$4 sm:$0xff]  }
 0x131   :  { %2434 = vmatprep.subr.bf16.mxu0 %v3751_v3  ;;  %2516 = vmatprep.subr.bf16.mxu1 %v3754_v4  ;;  %v3803_v3 = vld [vmem:[#allocation4 + $0x2a0] ss:$16 sps:$4 sm:$0xff]   ;;  %v3806_v4 = vld [vmem:[#allocation4 + $0x2a8] ss:$16 sps:$4 sm:$0xff]  }
 0x134   :  { %2435 = vmatpush1.bf16.msra.mxu0 %v3749_v5  ;;  %2517 = vmatpush1.bf16.msra.mxu1 %v3752_v6  ;;  %v3811_v5 = vld [vmem:[#allocation4 + $0x2c4] ss:$16 sps:$4 sm:$0xff]   ;;  %v3814_v6 = vld [vmem:[#allocation4 + $0x2cc] ss:$16 sps:$4 sm:$0xff]  }
 0x135   :  { %2436 = vmatprep.subr.bf16.mxu0 %v3757_v7  ;;  %2518 = vmatprep.subr.bf16.mxu1 %v3760_v8  ;;  %v3809_v7 = vld [vmem:[#allocation4 + $0x2c0] ss:$16 sps:$4 sm:$0xff]   ;;  %v3812_v8 = vld [vmem:[#allocation4 + $0x2c8] ss:$16 sps:$4 sm:$0xff]  }
 0x138   :  { %2437 = vmatpush1.bf16.msra.mxu0 %v3755_v9  ;;  %2519 = vmatpush1.bf16.msra.mxu1 %v3758_v10  ;;  %v3817_v9 = vld [vmem:[#allocation4 + $0x2e4] ss:$16 sps:$4 sm:$0xff]   ;;  %v3820_v10 = vld [vmem:[#allocation4 + $0x2ec] ss:$16 sps:$4 sm:$0xff]  }
 0x139   :  { %2438 = vmatprep.subr.bf16.mxu0 %v3763_v11  ;;  %2520 = vmatprep.subr.bf16.mxu1 %v3766_v12  ;;  %v3815_v11 = vld [vmem:[#allocation4 + $0x2e0] ss:$16 sps:$4 sm:$0xff]   ;;  %v3818_v12 = vld [vmem:[#allocation4 + $0x2e8] ss:$16 sps:$4 sm:$0xff]  }
 0x13c   :  { %2439 = vmatpush1.bf16.msra.mxu0 %v3761_v13  ;;  %2521 = vmatpush1.bf16.msra.mxu1 %v3764_v14  ;;  %v3823_v13 = vld [vmem:[#allocation4 + $0x304] ss:$16 sps:$4 sm:$0xff]   ;;  %v3826_v14 = vld [vmem:[#allocation4 + $0x30c] ss:$16 sps:$4 sm:$0xff]  }
 0x13d   :  { %2440 = vmatprep.subr.bf16.mxu0 %v3769_v15  ;;  %2522 = vmatprep.subr.bf16.mxu1 %v3772_v16  ;;  %v3821_v15 = vld [vmem:[#allocation4 + $0x300] ss:$16 sps:$4 sm:$0xff]   ;;  %v3824_v16 = vld [vmem:[#allocation4 + $0x308] ss:$16 sps:$4 sm:$0xff]  }
 0x140   :  { %2441 = vmatpush1.bf16.msra.mxu0 %v3767_v17  ;;  %2523 = vmatpush1.bf16.msra.mxu1 %v3770_v18  ;;  %v3829_v17 = vld [vmem:[#allocation4 + $0x324] ss:$16 sps:$4 sm:$0xff]   ;;  %v3832_v18 = vld [vmem:[#allocation4 + $0x32c] ss:$16 sps:$4 sm:$0xff]  }
 0x141   :  { %2451 = vmatprep.subr.bf16.mxu0 %v3775_v19  ;;  %2533 = vmatprep.subr.bf16.mxu1 %v3778_v20  ;;  %v3827_v19 = vld [vmem:[#allocation4 + $0x320] ss:$16 sps:$4 sm:$0xff]   ;;  %v3830_v20 = vld [vmem:[#allocation4 + $0x328] ss:$16 sps:$4 sm:$0xff]  }
 0x1d6   :  { %v1441_v30 = vpop.f32.mrb[0].mxu0  ;;  %v4102_v31 = vpop.f32.mrb[0].mxu1 }
 0x1d7   :  { %v3335_v32 = vadd.f32 %v1441_v30, %v283_v27  ;;  %v1443_v33 = vpop.f32.mrb[1].mxu0  ;;  %v1607_v34 = vpop.f32.mrb[1].mxu1  ;;  %v3838_v27 = vld [vmem:[#allocation4 + $0x34c] ss:$16 sps:$4 sm:$0xff]   ;;  %v3841_v30 = vld [vmem:[#allocation4 + $0x364] ss:$16 sps:$4 sm:$0xff]  }
 0x1d8   :  { %v3336_v35 = vadd.f32 %v1443_v33, %v287_v28  ;;  %v3338_v36 = vadd.f32 %v1607_v34, %v295_v29  ;;  %v1445_v37 = vpop.f32.mrb[2].mxu0  ;;  %v1609_v38 = vpop.f32.mrb[2].mxu1  ;;  %v3833_v28 = vld [vmem:[#allocation4 + $0x340] ss:$16 sps:$4 sm:$0xff]   ;;  %v3836_v29 = vld [vmem:[#allocation4 + $0x348] ss:$16 sps:$4 sm:$0xff]  }
 0x1d9   :  { %v1612_v39 = vmax.f32 %v3335_v32, 0.0  ;;  %v1446_v40 = vpop.f32.mrb[3].mxu0  ;;  %v1610_v41 = vpop.f32.mrb[3].mxu1  ;;  %v3844_v32 = vld [vmem:[#allocation4 + $0x36c] ss:$16 sps:$4 sm:$0xff]  }
 0x1da   :  { %v1613_v42 = vmax.f32 %v3336_v35, 0.0  ;;  %v1615_v43 = vmax.f32 %v3338_v36, 0.0  ;;  %v3839_v33 = vld [vmem:[#allocation4 + $0x360] ss:$16 sps:$4 sm:$0xff]   ;;  %v3842_v34 = vld [vmem:[#allocation4 + $0x368] ss:$16 sps:$4 sm:$0xff]  }
 0x1db   :  { %v1616_v47 = vpack.c.bf16 %v1612_v39, %v1612_v39  ;;  %v3847_v35 = vld [vmem:[#allocation4 + $0x384] ss:$16 sps:$4 sm:$0xff]   ;;  %v3850_v36 = vld [vmem:[#allocation4 + $0x38c] ss:$16 sps:$4 sm:$0xff]   ;;  %v3845_v37 = vld [vmem:[#allocation4 + $0x380] ss:$16 sps:$4 sm:$0xff]  }
 0x1dc   :  { %v1617_v44 = vpack.c.bf16 %v1613_v42, %v1613_v42  ;;  %v1619_v50 = vpack.c.bf16 %v1615_v43, %v1615_v43  ;;  %v3848_v38 = vld [vmem:[#allocation4 + $0x388] ss:$16 sps:$4 sm:$0xff]   ;;  %v290_v39 = vsub.s32 2, %v4083_v22  ;;  %v3853_v40 = vld [vmem:[#allocation4 + $0x3a4] ss:$16 sps:$4 sm:$0xff]  }
 0x1dd   :  { %v3856_v41 = vld [vmem:[#allocation4 + $0x3ac] ss:$16 sps:$4 sm:$0xff]   ;;  %v3851_v42 = vld [vmem:[#allocation4 + $0x3a0] ss:$16 sps:$4 sm:$0xff]   ;;  %v3854_v43 = vld [vmem:[#allocation4 + $0x3a8] ss:$16 sps:$4 sm:$0xff]  }
 0x1de   :  { %2442 = vmatprep.mubr.bf16.mxu0 %v1617_v44  ;;  %2524 = vmatprep.mubr.bf16.mxu1 %v1617_v44  ;;  %v291_v44 = vrot.slane %v4089_v24, %v290_v39  ;;  %v3869_v24 = vld [vmem:[#allocation6 + $0x40] sm:$0xff]  }
 0x1df   :  { %2443 = vmatmul.mubr.bf16.vlgmr.msra.gmra.mrb[4].mxu0 %v1616_v47  ;;  %2525 = vmatmul.mubr.bf16.vlgmr.msra.gmra.mrb[4].mxu1 %v1616_v47  ;;  %v3857_v47 = vld [vmem:[#allocation4 + $0x3c0] ss:$16 sps:$4 sm:$0xff]  }
 0x1e0   :  { %2452 = vmatpush1.bf16.msra.mxu0 %v3773_v45  ;;  %2534 = vmatpush1.bf16.msra.mxu1 %v3776_v46  ;;  %v3859_v45 = vld [vmem:[#allocation4 + $0x3c4] ss:$16 sps:$4 sm:$0xff]   ;;  %v3862_v46 = vld [vmem:[#allocation4 + $0x3cc] ss:$16 sps:$4 sm:$0xff]  }
 0x1e1   :  { %2483 = vmatprep.mubr.bf16.mxu0 %v1619_v50  ;;  %2565 = vmatprep.mubr.bf16.mxu1 %v1619_v50  ;;  %v3865_v50 = vld [vmem:[#allocation4 + $0x3e4] ss:$16 sps:$4 sm:$0xff]  }
 0x1e2   :  { %2453 = vmatprep.subr.bf16.mxu0 %v3781_v48  ;;  %2535 = vmatprep.subr.bf16.mxu1 %v3784_v49  ;;  %v3860_v48 = vld [vmem:[#allocation4 + $0x3c8] ss:$16 sps:$4 sm:$0xff]   ;;  %v3337_v49 = vadd.f32 %v4102_v31, %v291_v44 }
 0x1e3   :  { %v3873_v31 = vld [vmem:[#allocation6 + $0x48] sm:$0xff]  }
 0x1e4   :  { %2454 = vmatpush1.bf16.msra.mxu0 %v3779_v51  ;;  %2536 = vmatpush1.bf16.msra.mxu1 %v3782_v52  ;;  %v3868_v51 = vld [vmem:[#allocation4 + $0x3ec] ss:$16 sps:$4 sm:$0xff]   ;;  %v3863_v52 = vld [vmem:[#allocation4 + $0x3e0] ss:$16 sps:$4 sm:$0xff]  }
 0x1e5   :  { %2455 = vmatprep.subr.bf16.mxu0 %v3787_v53  ;;  %2537 = vmatprep.subr.bf16.mxu1 %v3790_v54  ;;  %v3866_v53 = vld [vmem:[#allocation4 + $0x3e8] ss:$16 sps:$4 sm:$0xff]   ;;  %v1614_v54 = vmax.f32 %v3337_v49, 0.0 }
 0x1e8   :  { %2456 = vmatpush1.bf16.msra.mxu0 %v3785_v55  ;;  %2538 = vmatpush1.bf16.msra.mxu1 %v3788_v56  ;;  %v3870_v55 = vld [vmem:[#allocation6 + $0xc0] sm:$0xff]  }
 0x1e9   :  { %2457 = vmatprep.subr.bf16.mxu0 %v3793_v57  ;;  %2539 = vmatprep.subr.bf16.mxu1 %v3796_v58  ;;  %v3871_v56 = vld [vmem:[#allocation6] sm:$0xff]   ;;  %v1618_v58 = vpack.c.bf16 %v1614_v54, %v1614_v54 }
 0x1ea   :  { %v3872_v57 = vld [vmem:[#allocation6 + $0x80] sm:$0xff]  }
 0x1ec   :  { %2458 = vmatpush1.bf16.msra.mxu0 %v3791_v59  ;;  %2540 = vmatpush1.bf16.msra.mxu1 %v3794_v60  ;;  %v3874_v59 = vld [vmem:[#allocation6 + $0xc8] sm:$0xff]  }
 0x1ed   :  { %2459 = vmatprep.subr.bf16.mxu0 %v3799_v61  ;;  %2541 = vmatprep.subr.bf16.mxu1 %v3802_v62  ;;  %v3875_v60 = vld [vmem:[#allocation6 + $0x8] sm:$0xff]   ;;  %v3877_v62 = vld [vmem:[#allocation6 + $0x50] sm:$0xff]  }
 0x1ee   :  { %v3876_v61 = vld [vmem:[#allocation6 + $0x88] sm:$0xff]  }
 0x1f0   :  { %2460 = vmatpush1.bf16.msra.mxu0 %v3797_v63  ;;  %2542 = vmatpush1.bf16.msra.mxu1 %v3800_v0  ;;  %v3878_v63 = vld [vmem:[#allocation6 + $0xd0] sm:$0xff]  }
 0x1f1   :  { %2461 = vmatprep.subr.bf16.mxu0 %v3805_v1  ;;  %2543 = vmatprep.subr.bf16.mxu1 %v3808_v2  ;;  %v3879_v0 = vld [vmem:[#allocation6 + $0x10] sm:$0xff]   ;;  %v3881_v2 = vld [vmem:[#allocation6 + $0x58] sm:$0xff]  }
 0x1f2   :  { %v3880_v1 = vld [vmem:[#allocation6 + $0x90] sm:$0xff]  }
 0x1f4   :  { %2462 = vmatpush1.bf16.msra.mxu0 %v3803_v3  ;;  %2544 = vmatpush1.bf16.msra.mxu1 %v3806_v4  ;;  %v3882_v3 = vld [vmem:[#allocation6 + $0xd8] sm:$0xff]  }
 0x1f5   :  { %2463 = vmatprep.subr.bf16.mxu0 %v3811_v5  ;;  %2545 = vmatprep.subr.bf16.mxu1 %v3814_v6  ;;  %v3883_v4 = vld [vmem:[#allocation6 + $0x18] sm:$0xff]   ;;  %v3885_v6 = vld [vmem:[#allocation6 + $0x60] sm:$0xff]  }
 0x1f6   :  { %v3884_v5 = vld [vmem:[#allocation6 + $0x98] sm:$0xff]  }
 0x1f8   :  { %2464 = vmatpush1.bf16.msra.mxu0 %v3809_v7  ;;  %2546 = vmatpush1.bf16.msra.mxu1 %v3812_v8  ;;  %v3886_v7 = vld [vmem:[#allocation6 + $0xe0] sm:$0xff]  }
 0x1f9   :  { %2465 = vmatprep.subr.bf16.mxu0 %v3817_v9  ;;  %2547 = vmatprep.subr.bf16.mxu1 %v3820_v10  ;;  %v3887_v8 = vld [vmem:[#allocation6 + $0x20] sm:$0xff]   ;;  %v3889_v10 = vld [vmem:[#allocation6 + $0x68] sm:$0xff]  }
 0x1fa   :  { %v3888_v9 = vld [vmem:[#allocation6 + $0xa0] sm:$0xff]  }
 0x1fc   :  { %2466 = vmatpush1.bf16.msra.mxu0 %v3815_v11  ;;  %2548 = vmatpush1.bf16.msra.mxu1 %v3818_v12  ;;  %v3890_v11 = vld [vmem:[#allocation6 + $0xe8] sm:$0xff]  }
 0x1fd   :  { %2467 = vmatprep.subr.bf16.mxu0 %v3823_v13  ;;  %2549 = vmatprep.subr.bf16.mxu1 %v3826_v14  ;;  %v3891_v12 = vld [vmem:[#allocation6 + $0x28] sm:$0xff]   ;;  %v3893_v14 = vld [vmem:[#allocation6 + $0x70] sm:$0xff]  }
 0x1fe   :  { %v3892_v13 = vld [vmem:[#allocation6 + $0xa8] sm:$0xff]  }
 0x200   :  { %2468 = vmatpush1.bf16.msra.mxu0 %v3821_v15  ;;  %2550 = vmatpush1.bf16.msra.mxu1 %v3824_v16  ;;  %v3894_v15 = vld [vmem:[#allocation6 + $0xf0] sm:$0xff]  }
 0x201   :  { %2469 = vmatprep.subr.bf16.mxu0 %v3829_v17  ;;  %2551 = vmatprep.subr.bf16.mxu1 %v3832_v18  ;;  %v3895_v16 = vld [vmem:[#allocation6 + $0x30] sm:$0xff]   ;;  %v3897_v18 = vld [vmem:[#allocation6 + $0x78] sm:$0xff]  }
 0x202   :  { %v3896_v17 = vld [vmem:[#allocation6 + $0xb0] sm:$0xff]  }
 0x204   :  { %2470 = vmatpush1.bf16.msra.mxu0 %v3827_v19  ;;  %2552 = vmatpush1.bf16.msra.mxu1 %v3830_v20  ;;  %v3898_v19 = vld [vmem:[#allocation6 + $0xf8] sm:$0xff]  }
 0x205   :  { %2471 = vmatprep.subr.bf16.mxu0 %v3835_v21  ;;  %2553 = vmatprep.subr.bf16.mxu1 %v3838_v27  ;;  %v3899_v20 = vld [vmem:[#allocation6 + $0x38] sm:$0xff]   ;;  %v1748_v27 = vld [vmem:[%s4130_s4] sm:$0xf] }
 0x206   :  { %v3900_v21 = vld [vmem:[#allocation6 + $0xb8] sm:$0xff]  }
 0x208   :  { %2472 = vmatpush1.bf16.msra.mxu0 %v3833_v28  ;;  %2554 = vmatpush1.bf16.msra.mxu1 %v3836_v29  ;;  %v1753_v28 = vrot.slane %v1748_v27, %v282_v23  ;;  %v1761_v29 = vrot.slane %v1748_v27, %v290_v39 }
 0x209   :  { %2473 = vmatprep.subr.bf16.mxu0 %v3841_v30  ;;  %2555 = vmatprep.subr.bf16.mxu1 %v3844_v32  ;;  %v1757_v30 = vrot.slane %v1748_v27, %v286_v25  ;;  %v1765_v32 = vrot.slane %v1748_v27, %v294_v26 }
 0x20c   :  { %2474 = vmatpush1.bf16.msra.mxu0 %v3839_v33  ;;  %2556 = vmatpush1.bf16.msra.mxu1 %v3842_v34 }
 0x20d   :  { %2475 = vmatprep.subr.bf16.mxu0 %v3847_v35  ;;  %2557 = vmatprep.subr.bf16.mxu1 %v3850_v36 }
 0x210   :  { %2476 = vmatpush1.bf16.msra.mxu0 %v3845_v37  ;;  %2558 = vmatpush1.bf16.msra.mxu1 %v3848_v38 }
 0x211   :  { %2477 = vmatprep.subr.bf16.mxu0 %v3853_v40  ;;  %2559 = vmatprep.subr.bf16.mxu1 %v3856_v41 }
 0x214   :  { %2478 = vmatpush1.bf16.msra.mxu0 %v3851_v42  ;;  %2560 = vmatpush1.bf16.msra.mxu1 %v3854_v43 }
 0x215   :  { %2479 = vmatprep.subr.bf16.mxu0 %v3859_v45  ;;  %2561 = vmatprep.subr.bf16.mxu1 %v3862_v46 }
 0x218   :  { %2480 = vmatpush1.bf16.msra.mxu0 %v3857_v47  ;;  %2562 = vmatpush1.bf16.msra.mxu1 %v3860_v48 }
 0x219   :  { %2481 = vmatprep.subr.bf16.mxu0 %v3865_v50  ;;  %2563 = vmatprep.subr.bf16.mxu1 %v3868_v51  ;;  %v3258_v51 = vld [vmem:[%s4132_s6] ss:$0 sm:$0xff] }
 0x21c   :  { %2482 = vmatpush1.bf16.msra.mxu0 %v3863_v52  ;;  %2564 = vmatpush1.bf16.msra.mxu1 %v3866_v53 }
 0x21d   :  { %3291 = vmatprep.subr.bf16.mxu0 %v3869_v24  ;;  %3313 = vmatprep.subr.bf16.mxu1 %v3870_v55 }
 0x21f   :  { %2484 = vmatmul.mubr.bf16.vlgmr.msra.gmra.mrb[4].mxu0 %v1618_v58  ;;  %2566 = vmatmul.mubr.bf16.vlgmr.msra.gmra.mrb[4].mxu1 %v1618_v58 }
 0x220   :  { %3292 = vmatpush3.bf16.msra.mxu0 %v3871_v56  ;;  %3314 = vmatpush3.bf16.msra.mxu1 %v3872_v57 }
 0x221   :  { %3293 = vmatprep.subr.bf16.mxu0 %v3873_v31  ;;  %3315 = vmatprep.subr.bf16.mxu1 %v3874_v59 }
 0x224   :  { %3294 = vmatpush3.bf16.msra.mxu0 %v3875_v60  ;;  %3316 = vmatpush3.bf16.msra.mxu1 %v3876_v61 }
 0x225   :  { %3295 = vmatprep.subr.bf16.mxu0 %v3877_v62  ;;  %3317 = vmatprep.subr.bf16.mxu1 %v3878_v63 }
 0x228   :  { %3296 = vmatpush3.bf16.msra.mxu0 %v3879_v0  ;;  %3318 = vmatpush3.bf16.msra.mxu1 %v3880_v1 }
 0x229   :  { %3297 = vmatprep.subr.bf16.mxu0 %v3881_v2  ;;  %3319 = vmatprep.subr.bf16.mxu1 %v3882_v3 }
 0x22c   :  { %3298 = vmatpush3.bf16.msra.mxu0 %v3883_v4  ;;  %3320 = vmatpush3.bf16.msra.mxu1 %v3884_v5 }
 0x22d   :  { %3299 = vmatprep.subr.bf16.mxu0 %v3885_v6  ;;  %3321 = vmatprep.subr.bf16.mxu1 %v3886_v7 }
 0x230   :  { %3300 = vmatpush3.bf16.msra.mxu0 %v3887_v8  ;;  %3322 = vmatpush3.bf16.msra.mxu1 %v3888_v9 }
 0x231   :  { %3301 = vmatprep.subr.bf16.mxu0 %v3889_v10  ;;  %3323 = vmatprep.subr.bf16.mxu1 %v3890_v11 }
 0x234   :  { %3302 = vmatpush3.bf16.msra.mxu0 %v3891_v12  ;;  %3324 = vmatpush3.bf16.msra.mxu1 %v3892_v13 }
 0x235   :  { %3303 = vmatprep.subr.bf16.mxu0 %v3893_v14  ;;  %3325 = vmatprep.subr.bf16.mxu1 %v3894_v15 }
 0x238   :  { %3304 = vmatpush3.bf16.msra.mxu0 %v3895_v16  ;;  %3326 = vmatpush3.bf16.msra.mxu1 %v3896_v17 }
 0x239   :  { %3305 = vmatprep.subr.bf16.mxu0 %v3897_v18  ;;  %3327 = vmatprep.subr.bf16.mxu1 %v3898_v19 }
 0x23c   :  { %3306 = vmatpush3.bf16.msra.mxu0 %v3899_v20  ;;  %3328 = vmatpush3.bf16.msra.mxu1 %v3900_v21 }
 0x2f2   :  { %v2485_v33 = vpop.f32.mrb[4].mxu0  ;;  %v2567_v34 = vpop.f32.mrb[4].mxu1 }
 0x2f3   :  { %v3339_v35 = vadd.f32 %v2485_v33, %v1753_v28  ;;  %v3341_v36 = vadd.f32 %v2567_v34, %v1761_v29  ;;  %v2487_v37 = vpop.f32.mrb[5].mxu0  ;;  %v2569_v38 = vpop.f32.mrb[5].mxu1 }
 0x2f4   :  { %v3340_v40 = vadd.f32 %v2487_v37, %v1757_v30  ;;  %v3342_v41 = vadd.f32 %v2569_v38, %v1765_v32  ;;  %v2489_v42 = vpop.f32.mrb[6].mxu0  ;;  %v2571_v43 = vpop.f32.mrb[6].mxu1 }
 0x2f5   :  { %v2574_v23 = vmax.f32 %v3339_v35, 0.0  ;;  %v2576_v44 = vmax.f32 %v3341_v36, 0.0  ;;  %v2490_v45 = vpop.f32.mrb[7].mxu0  ;;  %v2572_v39 = vpop.f32.mrb[7].mxu1 }
 0x2f6   :  { %v2575_v46 = vmax.f32 %v3340_v40, 0.0  ;;  %v2577_v47 = vmax.f32 %v3342_v41, 0.0 }
 0x2f7   :  { %v2578_v22 = vpack.c.bf16 %v2574_v23, %v2574_v23  ;;  %v2580_v26 = vpack.c.bf16 %v2576_v44, %v2576_v44 }
 0x2f8   :  { %v2579_v25 = vpack.c.bf16 %v2575_v46, %v2575_v46  ;;  %v2581_v48 = vpack.c.bf16 %v2577_v47, %v2577_v47 }
 0x2fa   :  { %2877 = vmatprep.mubr.bf16.mxu0 %v2579_v25  ;;  %2917 = vmatprep.mubr.bf16.mxu1 %v2581_v48 }
 0x2fb   :  { %2878 = vmatmul.mubr.bf16.vlgmr.msra.gmra.mrb[8].mxu0 %v2578_v22  ;;  %2918 = vmatmul.mubr.bf16.vlgmr.msra.gmra.mrb[8].mxu1 %v2580_v26 }
 0x3ce   :  { %v3307_v49 = vpop.f32.mrb[8].mxu0  ;;  %v3329_v50 = vpop.f32.mrb[8].mxu1 }
 0x3cf   :  { %v3308_v52 = vpop.f32.mrb[9].mxu0  ;;  %v3330_v53 = vpop.f32.mrb[9].mxu1 }
 0x3d0   :  { %v3309_v54 = vadd.f32 %v3308_v52, %v3307_v49  ;;  %v3331_v24 = vadd.f32 %v3330_v53, %v3329_v50  ;;  %v3310_v55 = vpop.f32.mrb[10].mxu0  ;;  %v3332_v56 = vpop.f32.mrb[10].mxu1 }
 0x3d1   :  { %v3311_v57 = vpop.f32.mrb[11].mxu0  ;;  %v3333_v58 = vpop.f32.mrb[11].mxu1 }
 0x3d2   :  { %v2880_v31 = vadd.f32 %v3309_v54, %v3258_v51 }
 0x3d4   :  { %v2920_v59 = vadd.f32 %v3331_v24, %v2880_v31 }
 0x3d6   :  { %2925 = vst [vmem:[%s4133_s7] sm:$0xff] %v2920_v59 }
 0x3d7   :  { %2930 = vsyncpa [#allocation3], 1 }
 0x3d8   :  { %2931 = vsyncpa [#allocation5], 1 }

</bundles_post_ra>
